<compile_context>
chip_gen: v6e
topology: v6e:2x2x1
jax: 0.10.0
libtpu: 0.0.40
codegen_flags: <defaults>
</compile_context>

<pallas_src>
import jax
import jax.numpy as jnp
from jax.experimental import pallas as pl
from jax.experimental.pallas import tpu as pltpu


_LANE = 128
_BF16_SUBLANE = 16  # bf16 packs 2 rows/sublane -> native (16, 128) tile


def _round_up(n, m):
    return ((n + m - 1) // m) * m


def _mlp_kernel(x_ref, w1_ref, b1_ref, w2_ref, b2_ref, w3_ref, b3_ref, o_ref):
    # Three MXU matmuls (bf16 inputs, f32 accumulate); bias-add + ReLU run on
    # the f32 accumulator (VPU), activations re-cast to bf16 only as the next
    # matmul's LHS.
    x = x_ref[...]
    h1 = jnp.dot(x, w1_ref[...], preferred_element_type=jnp.float32) + b1_ref[...]
    h1 = jnp.maximum(h1, 0.0).astype(jnp.bfloat16)
    h2 = jnp.dot(h1, w2_ref[...], preferred_element_type=jnp.float32) + b2_ref[...]
    h2 = jnp.maximum(h2, 0.0).astype(jnp.bfloat16)
    out = jnp.dot(h2, w3_ref[...], preferred_element_type=jnp.float32) + b3_ref[...]
    o_ref[...] = out.astype(o_ref.dtype)


def prepare_params(params):
    """Pad K/hidden/output dims to lane multiples (128) and cast weights to bf16.

    Zero-padding preserves the forward semantics: padded bias entries are 0 so
    the extra hidden columns are ReLU(0) = 0; padded weight rows/columns (and
    padded x columns) contribute nothing; extra output columns are sliced off
    after the call.  Call this ONCE for repeated inference.
    """
    w1, b1 = params["w1"], params["b1"]
    w2, b2 = params["w2"], params["b2"]
    w3, b3 = params["w3"], params["b3"]

    d_in, h = w1.shape
    y_dim = w3.shape[1]
    d_in_pad = _round_up(d_in, _LANE)   # 784 -> 896 (lane-dense K)
    h_pad = _round_up(h, _LANE)         # 300 -> 384
    y_pad = _round_up(y_dim, _LANE)     # 10  -> 128

    def pad2(a, rows, cols):
        return jnp.pad(a, ((0, rows - a.shape[0]), (0, cols - a.shape[1])))

    return {
        "w1": pad2(w1, d_in_pad, h_pad).astype(jnp.bfloat16),
        "b1": pad2(b1, 1, h_pad).astype(jnp.float32),
        "w2": pad2(w2, h_pad, h_pad).astype(jnp.bfloat16),
        "b2": pad2(b2, 1, h_pad).astype(jnp.float32),
        "w3": pad2(w3, h_pad, y_pad).astype(jnp.bfloat16),
        "b3": pad2(b3, 1, y_pad).astype(jnp.float32),
    }


def _choose_tile_m(B, tile_m):
    """Pick a batch tile: bf16-native for small B, >=2 grid steps for large B."""
    if B < 2 * _LANE:
        # Single grid step; minimal bf16-friendly padding (16-row sublanes).
        return _round_up(B, _BF16_SUBLANE)
    # Large batch: keep the grid length >= 2 so v7x megacore sharding has work
    # for both TensorCores, with tiles a multiple of 128 and capped at tile_m.
    half = _round_up((B + 1) // 2, _LANE)
    return max(_LANE, min(tile_m, half))


def classifier_forward(x, prepared, y_dim, *, tile_m=512):
    """x: (B, 784) float32. prepared: output of prepare_params. Returns (B, y_dim) f32."""
    w1, b1 = prepared["w1"], prepared["b1"]
    w2, b2 = prepared["w2"], prepared["b2"]
    w3, b3 = prepared["w3"], prepared["b3"]

    B, d_in = x.shape
    d_in_pad = w1.shape[0]
    y_pad = w3.shape[1]

    tm = _choose_tile_m(B, tile_m)
    b_pad = _round_up(B, tm)
    if b_pad != B or d_in_pad != d_in:
        x = jnp.pad(x, ((0, b_pad - B), (0, d_in_pad - d_in)))
    x = x.astype(jnp.bfloat16)

    const = lambda shape: pl.BlockSpec(shape, lambda i: (0, 0))
    vmem_limit = (32 << 20) if tm >= 512 else (16 << 20)

    out = pl.pallas_call(
        _mlp_kernel,
        out_shape=jax.ShapeDtypeStruct((b_pad, y_pad), jnp.float32),
        grid=(b_pad // tm,),
        in_specs=[
            pl.BlockSpec((tm, d_in_pad), lambda i: (i, 0)),  # x: tiled over batch
            const(w1.shape), const(b1.shape),                # weights: VMEM-resident
            const(w2.shape), const(b2.shape),
            const(w3.shape), const(b3.shape),
        ],
        out_specs=pl.BlockSpec((tm, y_pad), lambda i: (i, 0)),
        compiler_params=pltpu.CompilerParams(
            dimension_semantics=("parallel",),   # shard batch across TCs on v7x
            vmem_limit_bytes=vmem_limit,
        ),
    )(x, w1, b1, w2, b2, w3, b3)

    return out[:B, :y_dim]


def init_params(key, y_dim):
    """Deterministic synthetic init (PyTorch-like uniform fan-in scaling)."""
    ks = jax.random.split(key, 6)

    def linear(kw, kb, fan_in, fan_out):
        bound = 1.0 / jnp.sqrt(fan_in)
        w = jax.random.uniform(kw, (fan_in, fan_out), jnp.float32, -bound, bound)
        b = jax.random.uniform(kb, (1, fan_out), jnp.float32, -bound, bound)
        return w, b

    w1, b1 = linear(ks[0], ks[1], 784, 300)
    w2, b2 = linear(ks[2], ks[3], 300, 300)
    w3, b3 = linear(ks[4], ks[5], 300, y_dim)
    return {"w1": w1, "b1": b1, "w2": w2, "b2": b2, "w3": w3, "b3": b3}


def classifier_ref(x, params):
    """Pure-JAX f32 reference of the PyTorch forward."""
    h = jnp.maximum(x @ params["w1"] + params["b1"], 0.0)
    h = jnp.maximum(h @ params["w2"] + params["b2"], 0.0)
    return h @ params["w3"] + params["b3"]


if __name__ == "__main__":
    key = jax.random.PRNGKey(0)
    k_x, k_x2, k_p = jax.random.split(key, 3)

    y_dim = 10
    params = init_params(k_p, y_dim)
    prepared = prepare_params(params)

    # Small-batch path (single grid step, 16-row bf16 tile).
    B = 8
    x = jax.random.normal(k_x, (B, 784), jnp.float32)
    out = jax.block_until_ready(classifier_forward(x, prepared, y_dim))
    ref = classifier_ref(x, params)
    assert out.shape == (B, y_dim)
    # Tolerance loosened vs the f32 reference because the kernel uses bf16
    # weights/activations (with f32 accumulation).
    assert jnp.allclose(out, ref, atol=3e-2, rtol=3e-2), "mismatch vs reference (B=8)"

    # Larger-batch path (multi-step grid, exercises megacore-parallel axis).
    B2 = 320
    x2 = jax.random.normal(k_x2, (B2, 784), jnp.float32)
    out2 = jax.block_until_ready(classifier_forward(x2, prepared, y_dim))
    ref2 = classifier_ref(x2, params)
    assert out2.shape == (B2, y_dim)
    assert jnp.allclose(out2, ref2, atol=3e-2, rtol=3e-2), "mismatch vs reference (B=320)"

    print("KERNEL_OK")
</pallas_src>

<mosaic_0001>
module attributes {stable_mosaic.version = 11 : i64} {
  func.func @_mlp_kernel(%arg0: i32, %arg1: memref<16x896xbf16, #tpu.memory_space<vmem>>, %arg2: memref<896x384xbf16, #tpu.memory_space<vmem>>, %arg3: memref<1x384xf32, #tpu.memory_space<vmem>>, %arg4: memref<384x384xbf16, #tpu.memory_space<vmem>>, %arg5: memref<1x384xf32, #tpu.memory_space<vmem>>, %arg6: memref<384x128xbf16, #tpu.memory_space<vmem>>, %arg7: memref<1x128xf32, #tpu.memory_space<vmem>>, %arg8: memref<16x128xf32, #tpu.memory_space<vmem>>) attributes {dimension_semantics = [#tpu.dimension_semantics<parallel>], iteration_bounds = array<i64: 1>, scalar_prefetch = 0 : i64, scratch_operands = 0 : i64, tpu.core_type = #tpu.core_type<tc>, window_params = [{transform_indices = @transform_0, window_bounds = array<i64: 16, 896>}, {pipeline_mode = #tpu.pipeline_mode<synchronous>, transform_indices = @transform_1, window_bounds = array<i64: 896, 384>}, {pipeline_mode = #tpu.pipeline_mode<synchronous>, transform_indices = @transform_2, window_bounds = array<i64: 1, 384>}, {pipeline_mode = #tpu.pipeline_mode<synchronous>, transform_indices = @transform_3, window_bounds = array<i64: 384, 384>}, {pipeline_mode = #tpu.pipeline_mode<synchronous>, transform_indices = @transform_4, window_bounds = array<i64: 1, 384>}, {pipeline_mode = #tpu.pipeline_mode<synchronous>, transform_indices = @transform_5, window_bounds = array<i64: 384, 128>}, {pipeline_mode = #tpu.pipeline_mode<synchronous>, transform_indices = @transform_6, window_bounds = array<i64: 1, 128>}, {transform_indices = @transform_7, window_bounds = array<i64: 16, 128>}]} {
    %c0 = arith.constant 0 : index
    %c0_0 = arith.constant 0 : index
    %0 = vector.load %arg1[%c0, %c0_0] : memref<16x896xbf16, #tpu.memory_space<vmem>>, vector<16x896xbf16>
    %c0_1 = arith.constant 0 : index
    %c0_2 = arith.constant 0 : index
    %1 = vector.load %arg2[%c0_1, %c0_2] : memref<896x384xbf16, #tpu.memory_space<vmem>>, vector<896x384xbf16>
    %cst = arith.constant dense<0.000000e+00> : vector<16x384xf32>
    %2 = tpu.matmul %0, %1, %cst {dimension_numbers = #tpu.dot_dimension_numbers<[1], [0], [0], [1], [0, 0, 1, 1], [], []>} : vector<16x896xbf16>, vector<896x384xbf16>, vector<16x384xf32> -> vector<16x384xf32>
    %c0_3 = arith.constant 0 : index
    %c0_4 = arith.constant 0 : index
    %3 = vector.load %arg3[%c0_3, %c0_4] : memref<1x384xf32, #tpu.memory_space<vmem>>, vector<1x384xf32>
    %4 = vector.broadcast %3 : vector<1x384xf32> to vector<16x384xf32>
    %5 = arith.addf %2, %4 : vector<16x384xf32>
    %cst_5 = arith.constant 0.000000e+00 : f32
    %6 = vector.broadcast %cst_5 : f32 to vector<16x384xf32>
    %7 = arith.maximumf %5, %6 : vector<16x384xf32>
    %8 = arith.truncf %7 : vector<16x384xf32> to vector<16x384xbf16>
    %c0_6 = arith.constant 0 : index
    %c0_7 = arith.constant 0 : index
    %9 = vector.load %arg4[%c0_6, %c0_7] : memref<384x384xbf16, #tpu.memory_space<vmem>>, vector<384x384xbf16>
    %cst_8 = arith.constant dense<0.000000e+00> : vector<16x384xf32>
    %10 = tpu.matmul %8, %9, %cst_8 {dimension_numbers = #tpu.dot_dimension_numbers<[1], [0], [0], [1], [0, 0, 1, 1], [], []>} : vector<16x384xbf16>, vector<384x384xbf16>, vector<16x384xf32> -> vector<16x384xf32>
    %c0_9 = arith.constant 0 : index
    %c0_10 = arith.constant 0 : index
    %11 = vector.load %arg5[%c0_9, %c0_10] : memref<1x384xf32, #tpu.memory_space<vmem>>, vector<1x384xf32>
    %12 = vector.broadcast %11 : vector<1x384xf32> to vector<16x384xf32>
    %13 = arith.addf %10, %12 : vector<16x384xf32>
    %cst_11 = arith.constant 0.000000e+00 : f32
    %14 = vector.broadcast %cst_11 : f32 to vector<16x384xf32>
    %15 = arith.maximumf %13, %14 : vector<16x384xf32>
    %16 = arith.truncf %15 : vector<16x384xf32> to vector<16x384xbf16>
    %c0_12 = arith.constant 0 : index
    %c0_13 = arith.constant 0 : index
    %17 = vector.load %arg6[%c0_12, %c0_13] : memref<384x128xbf16, #tpu.memory_space<vmem>>, vector<384x128xbf16>
    %cst_14 = arith.constant dense<0.000000e+00> : vector<16x128xf32>
    %18 = tpu.matmul %16, %17, %cst_14 {dimension_numbers = #tpu.dot_dimension_numbers<[1], [0], [0], [1], [0, 0, 1, 1], [], []>} : vector<16x384xbf16>, vector<384x128xbf16>, vector<16x128xf32> -> vector<16x128xf32>
    %c0_15 = arith.constant 0 : index
    %c0_16 = arith.constant 0 : index
    %19 = vector.load %arg7[%c0_15, %c0_16] : memref<1x128xf32, #tpu.memory_space<vmem>>, vector<1x128xf32>
    %20 = vector.broadcast %19 : vector<1x128xf32> to vector<16x128xf32>
    %21 = arith.addf %18, %20 : vector<16x128xf32>
    %c0_17 = arith.constant 0 : index
    %c0_18 = arith.constant 0 : index
    %22 = vector.load %arg8[%c0_17, %c0_18] : memref<16x128xf32, #tpu.memory_space<vmem>>, vector<16x128xf32>
    tpu.vector_store %arg8[%c0_17, %c0_18], %21 {strides = array<i32>} : memref<16x128xf32, #tpu.memory_space<vmem>>, vector<16x128xf32>,
    return
  }
  func.func @transform_0(%arg0: i32) -> (i32, i32) {
    %c0_i32 = arith.constant 0 : i32
    %c0_i32_0 = arith.constant 0 : i32
    return %arg0, %c0_i32 : i32, i32
  }
  func.func @transform_1(%arg0: i32) -> (i32, i32) {
    %c0_i32 = arith.constant 0 : i32
    %c0_i32_0 = arith.constant 0 : i32
    %c0_i32_1 = arith.constant 0 : i32
    return %c0_i32, %c0_i32_0 : i32, i32
  }
  func.func @transform_2(%arg0: i32) -> (i32, i32) {
    %c0_i32 = arith.constant 0 : i32
    %c0_i32_0 = arith.constant 0 : i32
    %c0_i32_1 = arith.constant 0 : i32
    return %c0_i32, %c0_i32_0 : i32, i32
  }
  func.func @transform_3(%arg0: i32) -> (i32, i32) {
    %c0_i32 = arith.constant 0 : i32
    %c0_i32_0 = arith.constant 0 : i32
    %c0_i32_1 = arith.constant 0 : i32
    return %c0_i32, %c0_i32_0 : i32, i32
  }
  func.func @transform_4(%arg0: i32) -> (i32, i32) {
    %c0_i32 = arith.constant 0 : i32
    %c0_i32_0 = arith.constant 0 : i32
    %c0_i32_1 = arith.constant 0 : i32
    return %c0_i32, %c0_i32_0 : i32, i32
  }
  func.func @transform_5(%arg0: i32) -> (i32, i32) {
    %c0_i32 = arith.constant 0 : i32
    %c0_i32_0 = arith.constant 0 : i32
    %c0_i32_1 = arith.constant 0 : i32
    return %c0_i32, %c0_i32_0 : i32, i32
  }
  func.func @transform_6(%arg0: i32) -> (i32, i32) {
    %c0_i32 = arith.constant 0 : i32
    %c0_i32_0 = arith.constant 0 : i32
    %c0_i32_1 = arith.constant 0 : i32
    return %c0_i32, %c0_i32_0 : i32, i32
  }
  func.func @transform_7(%arg0: i32) -> (i32, i32) {
    %c0_i32 = arith.constant 0 : i32
    %c0_i32_0 = arith.constant 0 : i32
    return %arg0, %c0_i32 : i32, i32
  }
}

</mosaic_0001>

<bundles_post_ra>
// kernel: tpu_custom_call.1
= control target key start
LH: loop header
LB: loop body
LE: loop exit
PB: predicated region body
PF: predicated region fallthrough
CT: control target
= control target key end

     0   :  { %12 = vsyncpa [#allocation3], 0  ;;  %s3708_s0 = inlined_call_operand.hbm [shape: bf16[16,896], index: 0, kind: input, shape index: {}]   ;;  %s3709_s1 = inlined_call_operand.hbm [shape: bf16[896,384], index: 1, kind: input, shape index: {}]   ;;  %s3710_s2 = inlined_call_operand.vmem [shape: f32[1,384], index: 2, kind: input, shape index: {}]   ;;  %s3711_s3 = inlined_call_operand.hbm [shape: bf16[384,384], index: 3, kind: input, shape index: {}]   ;;  %s3712_s4 = inlined_call_operand.vmem [shape: f32[1,384], index: 4, kind: input, shape index: {}]   ;;  %s3713_s5 = inlined_call_operand.hbm [shape: bf16[384,128], index: 5, kind: input, shape index: {}]   ;;  %s3714_s6 = inlined_call_operand.vmem [shape: f32[1,128], index: 6, kind: input, shape index: {}]   ;;  %s3715_s7 = inlined_call_operand.hbm [shape: f32[16,128], index: 7, kind: output, shape index: {}]  }
   0x1   :  { %13 = vsyncpa [#allocation6], 0 }
   0x2   :  { %14 = vsyncpa [#allocation9], 0 }
   0x3   :  { %15 = vsyncpa [#allocation4], 0  ;;  %s3532_s24 = smov [#allocation5]  }
   0x4   :  { %s33_s25 = sshll.u32 %s3532_s24, 4  ;;  %s34_s25 = int_to_ptr.vmem [resolvable:$true] %s33_s25 }
   0x5   :  { %s3432_s26 = scalar_lea.vmem %s34_s25, 21504  ;;  %p3437_p1 = scmp.lt.s32.totalorder %s34_s25, %s34_s25 }
   0x6   :  { %p3433_p0 = scmp.ne.s32.totalorder %s34_s25, %s3432_s26  ;;  %p3438_p2 = scmp.lt.s32.totalorder %s3432_s26, %s3432_s26 }
   0x8   :  { %p3439_p3 = por %p3438_p2, %p3437_p1 }
   0xa   :  { %p3440_p4 = pnand %p3439_p3, %p3433_p0 }
   0xc   :  { %3443 = shalt.err (!%p3440_p4)
}
   0xd   :  { %s3533_s27 = smov 192   ;;  %s3534_s28 = smov 12  }
   0xe   :  { %39 = dma.hbm_to_vmem [thread:$0]  %s3709_s1, 21504, %s34_s25, [#allocation6], %s3533_s27, %s3533_s27, %s3534_s28  }
   0xf   :  { %s3535_s8 = smov [#allocation2]  }
  0x10   :  { %s21_s9 = sshll.u32 %s3535_s8, 4  ;;  %s22_s9 = int_to_ptr.vmem [resolvable:$true] %s21_s9 }
  0x11   :  { %s3452_s10 = scalar_lea.vmem %s22_s9, 896  ;;  %p3457_p6 = scmp.lt.s32.totalorder %s22_s9, %s22_s9 }
  0x12   :  { %p3453_p5 = scmp.ne.s32.totalorder %s22_s9, %s3452_s10  ;;  %p3458_p7 = scmp.lt.s32.totalorder %s3452_s10, %s3452_s10 }
  0x14   :  { %p3459_p8 = por %p3458_p7, %p3457_p6 }
  0x16   :  { %p3460_p9 = pnand %p3459_p8, %p3453_p5 }
  0x18   :  { %3463 = shalt.err (!%p3460_p9)
}
  0x19   :  { %s3536_s11 = smov 448   ;;  %s3537_s12 = smov 28  }
  0x1a   :  { %27 = dma.hbm_to_vmem [thread:$0]  %s3708_s0, 896, %s22_s9, [#allocation3], %s3536_s11, %s3536_s11, %s3537_s12  }
  0x1b   :  { %s3538_s15 = smov [#allocation7]   ;;  %s3539_s17 = smov [#allocation8]  }
  0x1c   :  { %s47_s16 = sshll.u32 %s3538_s15, 4  ;;  %s61_s1 = sshll.u32 %s3539_s17, 4  ;;  %s48_s16 = int_to_ptr.vmem [resolvable:$true] %s47_s16  ;;  %s62_s1 = int_to_ptr.vmem [resolvable:$true] %s61_s1 }
  0x1d   :  { %s3472_s18 = scalar_lea.vmem %s48_s16, 9216  ;;  %p3477_p11 = scmp.lt.s32.totalorder %s48_s16, %s48_s16 }
  0x1e   :  { %p3473_p10 = scmp.ne.s32.totalorder %s48_s16, %s3472_s18  ;;  %p3478_p12 = scmp.lt.s32.totalorder %s3472_s18, %s3472_s18 }
  0x20   :  { %p3479_p13 = por %p3478_p12, %p3477_p11 }
  0x22   :  { %p3480_p0 = pnand %p3479_p13, %p3473_p10 }
  0x24   :  { %3483 = shalt.err (!%p3480_p0)
}
  0x25   :  { %53 = dma.hbm_to_vmem [thread:$0]  %s3711_s3, 9216, %s48_s16, [#allocation6], %s3533_s27, %s3533_s27, %s3534_s28  }
  0x26   :  { %s3492_s0 = scalar_lea.vmem %s62_s1, 3072  ;;  %p3497_p2 = scmp.lt.s32.totalorder %s62_s1, %s62_s1 }
  0x27   :  { %p3493_p1 = scmp.ne.s32.totalorder %s62_s1, %s3492_s0  ;;  %p3498_p3 = scmp.lt.s32.totalorder %s3492_s0, %s3492_s0 }
  0x29   :  { %p3499_p4 = por %p3498_p3, %p3497_p2 }
  0x2b   :  { %p3500_p5 = pnand %p3499_p4, %p3493_p1 }
  0x2d   :  { %3503 = shalt.err (!%p3500_p5)
}
  0x2e   :  { %s3540_s21 = smov 64   ;;  %s3541_s22 = smov 4  }
  0x2f   :  { %67 = dma.hbm_to_vmem [thread:$0]  %s3713_s5, 3072, %s62_s1, [#allocation9], %s3540_s21, %s3540_s21, %s3541_s22  }
  0x30   :  { %3524 = dma.done.wait [#allocation3], 896  }
  0x31   :  { %3525 = vsyncadd [#allocation3], 4294966400 }
  0x32   :  { %3526 = dma.done.wait [#allocation6], 30720  }
  0x33   :  { %3527 = vsyncadd [#allocation6], 4294936576 }
  0x34   :  { %3528 = dma.done.wait [#allocation9], 3072  }
  0x35   :  { %3529 = vsyncadd [#allocation9], 4294964224  ;;  %v3070_v0 = vld [vmem:[#allocation5 + $0xac] ss:$12 sps:$4 sm:$0xff]   ;;  %v3072_v1 = vld [vmem:[#allocation5 + $0xa8] ss:$12 sps:$4 sm:$0xff]  }
  0x36   :  { %1264 = vmatprep.subr.bf16.mxu0 %v3070_v0  ;;  %v3073_v2 = vld [vmem:[#allocation5 + $0x22c] ss:$12 sps:$4 sm:$0xff]   ;;  %v3075_v3 = vld [vmem:[#allocation5 + $0x228] ss:$12 sps:$4 sm:$0xff]   ;;  %v3078_v5 = vld [vmem:[#allocation5 + $0x90] ss:$12 sps:$4 sm:$0xff]  }
  0x37   :  { %1265 = vmatpush1.bf16.msra.mxu0 %v3072_v1  ;;  %v3076_v4 = vld [vmem:[#allocation5 + $0x94] ss:$12 sps:$4 sm:$0xff]   ;;  %1307 = vmatprep.subr.bf16.mxu1 %v3073_v2  ;;  %v3081_v7 = vld [vmem:[#allocation5 + $0x210] ss:$12 sps:$4 sm:$0xff]   ;;  %v3084_v9 = vld [vmem:[#allocation5 + $0x78] ss:$12 sps:$4 sm:$0xff]  }
  0x38   :  { %v3079_v6 = vld [vmem:[#allocation5 + $0x214] ss:$12 sps:$4 sm:$0xff]   ;;  %1308 = vmatpush1.bf16.msra.mxu1 %v3075_v3  ;;  %1266 = vmatprep.subr.bf16.mxu0 %v3076_v4  ;;  %v3082_v8 = vld [vmem:[#allocation5 + $0x7c] ss:$12 sps:$4 sm:$0xff]   ;;  %v3088_v11 = vld [vmem:[#allocation5 + $0x64] ss:$12 sps:$4 sm:$0xff]  }
  0x39   :  { %1309 = vmatprep.subr.bf16.mxu1 %v3079_v6  ;;  %v3085_v10 = vld [vmem:[#allocation5 + $0x1fc] ss:$12 sps:$4 sm:$0xff]   ;;  %v3087_v12 = vld [vmem:[#allocation5 + $0x1f8] ss:$12 sps:$4 sm:$0xff]   ;;  %v3090_v14 = vld [vmem:[#allocation5 + $0x60] ss:$12 sps:$4 sm:$0xff]  }
  0x3a   :  { %v3091_v13 = vld [vmem:[#allocation5 + $0x1e4] ss:$12 sps:$4 sm:$0xff]   ;;  %v3094_v15 = vld [vmem:[#allocation5 + $0x4c] ss:$12 sps:$4 sm:$0xff]   ;;  %v3096_v18 = vld [vmem:[#allocation5 + $0x48] ss:$12 sps:$4 sm:$0xff]  }
  0x3b   :  { %1267 = vmatpush1.bf16.msra.mxu0 %v3078_v5  ;;  %v3093_v16 = vld [vmem:[#allocation5 + $0x1e0] ss:$12 sps:$4 sm:$0xff]   ;;  %v3099_v20 = vld [vmem:[#allocation5 + $0x1c8] ss:$12 sps:$4 sm:$0xff]   ;;  %v3102_v22 = vld [vmem:[#allocation5 + $0x30] ss:$12 sps:$4 sm:$0xff]  }
  0x3c   :  { %1268 = vmatprep.subr.bf16.mxu0 %v3082_v8  ;;  %1310 = vmatpush1.bf16.msra.mxu1 %v3081_v7  ;;  %v3097_v17 = vld [vmem:[#allocation5 + $0x1cc] ss:$12 sps:$4 sm:$0xff]   ;;  %v3100_v19 = vld [vmem:[#allocation5 + $0x34] ss:$12 sps:$4 sm:$0xff]   ;;  %v3106_v23 = vld [vmem:[#allocation5 + $0x1c] ss:$12 sps:$4 sm:$0xff]  }
  0x3d   :  { %1311 = vmatprep.subr.bf16.mxu1 %v3085_v10  ;;  %v3103_v21 = vld [vmem:[#allocation5 + $0x1b4] ss:$12 sps:$4 sm:$0xff]   ;;  %v3105_v24 = vld [vmem:[#allocation5 + $0x1b0] ss:$12 sps:$4 sm:$0xff]   ;;  %v3108_v26 = vld [vmem:[#allocation5 + $0x18] ss:$12 sps:$4 sm:$0xff]  }
  0x3e   :  { %v3109_v25 = vld [vmem:[#allocation5 + $0x19c] ss:$12 sps:$4 sm:$0xff]   ;;  %v3112_v27 = vld [vmem:[#allocation5 + $0x4] ss:$12 sps:$4 sm:$0xff]   ;;  %v3114_v30 = vld [vmem:[#allocation5] ss:$12 sps:$4 sm:$0xff]  }
  0x3f   :  { %1269 = vmatpush1.bf16.msra.mxu0 %v3084_v9  ;;  %v3111_v28 = vld [vmem:[#allocation5 + $0x198] ss:$12 sps:$4 sm:$0xff]   ;;  %v3117_v32 = vld [vmem:[#allocation5 + $0x180] ss:$12 sps:$4 sm:$0xff]   ;;  %v3120_v34 = vld [vmem:[#allocation5 + $0x168] ss:$12 sps:$4 sm:$0xff]  }
  0x40   :  { %1270 = vmatprep.subr.bf16.mxu0 %v3088_v11  ;;  %1312 = vmatpush1.bf16.msra.mxu1 %v3087_v12  ;;  %v3115_v29 = vld [vmem:[#allocation5 + $0x184] ss:$12 sps:$4 sm:$0xff]   ;;  %v3118_v31 = vld [vmem:[#allocation5 + $0x16c] ss:$12 sps:$4 sm:$0xff]   ;;  %v3124_v35 = vld [vmem:[#allocation5 + $0x154] ss:$12 sps:$4 sm:$0xff]  }
  0x41   :  { %1313 = vmatprep.subr.bf16.mxu1 %v3091_v13  ;;  %v3121_v33 = vld [vmem:[#allocation5 + $0x2ec] ss:$12 sps:$4 sm:$0xff]   ;;  %v3123_v36 = vld [vmem:[#allocation5 + $0x2e8] ss:$12 sps:$4 sm:$0xff]   ;;  %v3126_v38 = vld [vmem:[#allocation5 + $0x150] ss:$12 sps:$4 sm:$0xff]  }
  0x42   :  { %v3127_v37 = vld [vmem:[#allocation5 + $0x2d4] ss:$12 sps:$4 sm:$0xff]   ;;  %v3130_v39 = vld [vmem:[#allocation5 + $0x13c] ss:$12 sps:$4 sm:$0xff]   ;;  %v3132_v42 = vld [vmem:[#allocation5 + $0x138] ss:$12 sps:$4 sm:$0xff]  }
  0x43   :  { %1271 = vmatpush1.bf16.msra.mxu0 %v3090_v14  ;;  %v3129_v40 = vld [vmem:[#allocation5 + $0x2d0] ss:$12 sps:$4 sm:$0xff]   ;;  %v3135_v44 = vld [vmem:[#allocation5 + $0x2b8] ss:$12 sps:$4 sm:$0xff]   ;;  %v3138_v46 = vld [vmem:[#allocation5 + $0x120] ss:$12 sps:$4 sm:$0xff]  }
  0x44   :  { %1272 = vmatprep.subr.bf16.mxu0 %v3094_v15  ;;  %1314 = vmatpush1.bf16.msra.mxu1 %v3093_v16  ;;  %v3133_v41 = vld [vmem:[#allocation5 + $0x2bc] ss:$12 sps:$4 sm:$0xff]   ;;  %v3136_v43 = vld [vmem:[#allocation5 + $0x124] ss:$12 sps:$4 sm:$0xff]   ;;  %v3142_v48 = vld [vmem:[#allocation5 + $0x10c] ss:$12 sps:$4 sm:$0xff]  }
  0x45   :  { %1315 = vmatprep.subr.bf16.mxu1 %v3097_v17  ;;  %v3139_v45 = vld [vmem:[#allocation5 + $0x2a4] ss:$12 sps:$4 sm:$0xff]   ;;  %v3606_v47 = vld [vmem:[#allocation2 + $0x4] ss:$28 sps:$4 sm:$0xff]   ;;  %v3148_v53 = vld [vmem:[#allocation5 + $0xf4] ss:$12 sps:$4 sm:$0xff]  }
  0x46   :  { %v3141_v49 = vld [vmem:[#allocation5 + $0x2a0] ss:$12 sps:$4 sm:$0xff]   ;;  %1296 = vmatprep.mubr.bf16.mxu0 %v3606_v47  ;;  %v3609_v51 = vld [vmem:[#allocation2 + $0xc] ss:$28 sps:$4 sm:$0xff]   ;;  %v3154_v57 = vld [vmem:[#allocation5 + $0xdc] ss:$12 sps:$4 sm:$0xff]  }
  0x47   :  { %1273 = vmatpush1.bf16.msra.mxu0 %v3096_v18  ;;  %v3145_v50 = vld [vmem:[#allocation5 + $0x28c] ss:$12 sps:$4 sm:$0xff]   ;;  %v3144_v52 = vld [vmem:[#allocation5 + $0x108] ss:$12 sps:$4 sm:$0xff]   ;;  %1339 = vmatprep.mubr.bf16.mxu1 %v3609_v51  ;;  %v3150_v56 = vld [vmem:[#allocation5 + $0xf0] ss:$12 sps:$4 sm:$0xff]  }
  0x48   :  { %1274 = vmatprep.subr.bf16.mxu0 %v3100_v19  ;;  %1316 = vmatpush1.bf16.msra.mxu1 %v3099_v20  ;;  %v3147_v54 = vld [vmem:[#allocation5 + $0x288] ss:$12 sps:$4 sm:$0xff]   ;;  %v3153_v58 = vld [vmem:[#allocation5 + $0x270] ss:$12 sps:$4 sm:$0xff]   ;;  %v3156_v60 = vld [vmem:[#allocation5 + $0xd8] ss:$12 sps:$4 sm:$0xff]  }
  0x49   :  { %1317 = vmatprep.subr.bf16.mxu1 %v3103_v21  ;;  %v3151_v55 = vld [vmem:[#allocation5 + $0x274] ss:$12 sps:$4 sm:$0xff]   ;;  %v3157_v59 = vld [vmem:[#allocation5 + $0x25c] ss:$12 sps:$4 sm:$0xff]   ;;  %v3160_v61 = vld [vmem:[#allocation5 + $0xc4] ss:$12 sps:$4 sm:$0xff]  }
  0x4a   :  { %v3159_v62 = vld [vmem:[#allocation5 + $0x258] ss:$12 sps:$4 sm:$0xff]   ;;  %v3162_v0 = vld [vmem:[#allocation5 + $0xc0] ss:$12 sps:$4 sm:$0xff]   ;;  %v3169_v5 = vld [vmem:[#allocation5 + $0x3a8] ss:$12 sps:$4 sm:$0xff]  }
  0x4b   :  { %1275 = vmatpush1.bf16.msra.mxu0 %v3102_v22  ;;  %v3163_v63 = vld [vmem:[#allocation5 + $0x244] ss:$12 sps:$4 sm:$0xff]   ;;  %v3171_v1 = vld [vmem:[#allocation5 + $0x3ac] ss:$12 sps:$4 sm:$0xff]   ;;  %v3180_v7 = vld [vmem:[#allocation5 + $0x394] ss:$12 sps:$4 sm:$0xff]  }
  0x4c   :  { %1276 = vmatprep.subr.bf16.mxu0 %v3106_v23  ;;  %1318 = vmatpush1.bf16.msra.mxu1 %v3105_v24  ;;  %v3168_v2 = vld [vmem:[#allocation5 + $0x240] ss:$12 sps:$4 sm:$0xff]   ;;  %v3612_v3 = vld [vmem:[#allocation2] ss:$28 sps:$4 sm:$0xff]   ;;  %v3178_v10 = vld [vmem:[#allocation5 + $0x390] ss:$12 sps:$4 sm:$0xff]  }
  0x4d   :  { %1319 = vmatprep.subr.bf16.mxu1 %v3109_v25  ;;  %v3177_v4 = vld [vmem:[#allocation5 + $0x52c] ss:$12 sps:$4 sm:$0xff]   ;;  %v3175_v8 = vld [vmem:[#allocation5 + $0x528] ss:$12 sps:$4 sm:$0xff]   ;;  %v3181_v12 = vld [vmem:[#allocation5 + $0x510] ss:$12 sps:$4 sm:$0xff]  }
  0x4e   :  { %v3614_v6 = vld [vmem:[#allocation2 + $0x8] ss:$28 sps:$4 sm:$0xff]   ;;  %v3183_v9 = vld [vmem:[#allocation5 + $0x514] ss:$12 sps:$4 sm:$0xff]   ;;  %v3186_v11 = vld [vmem:[#allocation5 + $0x37c] ss:$12 sps:$4 sm:$0xff]  }
  0x4f   :  { %1277 = vmatpush1.bf16.msra.mxu0 %v3108_v26  ;;  %v3542_v13 = vmov 0   ;;  %v3189_v14 = vld [vmem:[#allocation5 + $0x4fc] ss:$12 sps:$4 sm:$0xff]   ;;  %v3184_v15 = vld [vmem:[#allocation5 + $0x378] ss:$12 sps:$4 sm:$0xff]   ;;  %vm3544_vm0 = vmmov 0  }
  0x50   :  { %1278 = vmatprep.subr.bf16.mxu0 %v3112_v27  ;;  %1320 = vmatpush1.bf16.msra.mxu1 %v3111_v28  ;;  %v3192_v16 = vld [vmem:[#allocation5 + $0x364] ss:$12 sps:$4 sm:$0xff]   ;;  %v3190_v19 = vld [vmem:[#allocation5 + $0x360] ss:$12 sps:$4 sm:$0xff]   ;;  %v3196_v23 = vld [vmem:[#allocation5 + $0x348] ss:$12 sps:$4 sm:$0xff]  }
  0x51   :  { %1321 = vmatprep.subr.bf16.mxu1 %v3115_v29  ;;  %v3187_v17 = vld [vmem:[#allocation5 + $0x4f8] ss:$12 sps:$4 sm:$0xff]   ;;  %v3193_v21 = vld [vmem:[#allocation5 + $0x4e0] ss:$12 sps:$4 sm:$0xff]   ;;  %v3199_v25 = vld [vmem:[#allocation5 + $0x4c8] ss:$12 sps:$4 sm:$0xff]  }
  0x52   :  { %v3195_v18 = vld [vmem:[#allocation5 + $0x4e4] ss:$12 sps:$4 sm:$0xff]   ;;  %v3198_v20 = vld [vmem:[#allocation5 + $0x34c] ss:$12 sps:$4 sm:$0xff]   ;;  %v3204_v24 = vld [vmem:[#allocation5 + $0x334] ss:$12 sps:$4 sm:$0xff]  }
  0x53   :  { %1279 = vmatpush1.bf16.msra.mxu0 %v3114_v30  ;;  %v3201_v22 = vld [vmem:[#allocation5 + $0x4cc] ss:$12 sps:$4 sm:$0xff]   ;;  %v3207_v26 = vld [vmem:[#allocation5 + $0x4b4] ss:$12 sps:$4 sm:$0xff]   ;;  %v3202_v27 = vld [vmem:[#allocation5 + $0x330] ss:$12 sps:$4 sm:$0xff]  }
  0x54   :  { %1280 = vmatprep.subr.bf16.mxu0 %v3118_v31  ;;  %1322 = vmatpush1.bf16.msra.mxu1 %v3117_v32  ;;  %v3210_v28 = vld [vmem:[#allocation5 + $0x31c] ss:$12 sps:$4 sm:$0xff]   ;;  %v3208_v31 = vld [vmem:[#allocation5 + $0x318] ss:$12 sps:$4 sm:$0xff]   ;;  %s3545_s27 = smov [#allocation10]  }
  0x55   :  { %1323 = vmatprep.subr.bf16.mxu1 %v3121_v33  ;;  %v3205_v29 = vld [vmem:[#allocation5 + $0x4b0] ss:$12 sps:$4 sm:$0xff]   ;;  %v3211_v32 = vld [vmem:[#allocation5 + $0x498] ss:$12 sps:$4 sm:$0xff]   ;;  %s2571_s28 = sshll.u32 %s3545_s27, 4  ;;  %s2572_s28 = int_to_ptr.vmem [resolvable:$true] %s2571_s28 }
  0x56   :  { %v3213_v30 = vld [vmem:[#allocation5 + $0x49c] ss:$12 sps:$4 sm:$0xff]   ;;  %v3216_v33 = vld [vmem:[#allocation5 + $0x304] ss:$12 sps:$4 sm:$0xff]   ;;  %s3504_s29 = scalar_lea.vmem %s2572_s28, 256  ;;  %p3509_p7 = scmp.lt.s32.totalorder %s2572_s28, %s2572_s28 }
  0x57   :  { %1281 = vmatpush2.bf16.msra.mxu0 %v3120_v34  ;;  %v3214_v34 = vld [vmem:[#allocation5 + $0x300] ss:$12 sps:$4 sm:$0xff]   ;;  %p3505_p6 = scmp.ne.s32.totalorder %s2572_s28, %s3504_s29  ;;  %p3510_p8 = scmp.lt.s32.totalorder %s3504_s29, %s3504_s29 }
  0x58   :  { %1282 = vmatprep.subr.bf16.mxu0 %v3124_v35  ;;  %1324 = vmatpush2.bf16.msra.mxu1 %v3123_v36  ;;  %v3219_v35 = vld [vmem:[#allocation5 + $0x484] ss:$12 sps:$4 sm:$0xff]   ;;  %v3217_v36 = vld [vmem:[#allocation5 + $0x480] ss:$12 sps:$4 sm:$0xff]  }
  0x59   :  { %1325 = vmatprep.subr.bf16.mxu1 %v3127_v37  ;;  %v3222_v37 = vld [vmem:[#allocation5 + $0x46c] ss:$12 sps:$4 sm:$0xff]   ;;  %p3511_p9 = por %p3510_p8, %p3509_p7 }
  0x5b   :  { %1283 = vmatpush2.bf16.msra.mxu0 %v3126_v38  ;;  %v3220_v38 = vld [vmem:[#allocation5 + $0x468] ss:$12 sps:$4 sm:$0xff]   ;;  %p3512_p10 = pnand %p3511_p9, %p3505_p6 }
  0x5c   :  { %1284 = vmatprep.subr.bf16.mxu0 %v3130_v39  ;;  %1326 = vmatpush2.bf16.msra.mxu1 %v3129_v40  ;;  %v3223_v39 = vld [vmem:[#allocation5 + $0x170] ss:$12 sps:$4 sm:$0xff]  }
  0x5d   :  { %1327 = vmatprep.subr.bf16.mxu1 %v3133_v41  ;;  %v3619_v40 = vld [vmem:[#allocation2 + $0x18] ss:$28 sps:$4 sm:$0xff]  }
  0x5e   :  { %v3621_v41 = vld [vmem:[#allocation2 + $0x14] ss:$28 sps:$4 sm:$0xff]  }
  0x5f   :  { %1285 = vmatpush2.bf16.msra.mxu0 %v3132_v42  ;;  %v3225_v42 = vld [vmem:[#allocation5 + $0xb0] ss:$12 sps:$4 sm:$0xff]  }
  0x60   :  { %1286 = vmatprep.subr.bf16.mxu0 %v3136_v43  ;;  %1328 = vmatpush2.bf16.msra.mxu1 %v3135_v44  ;;  %v3228_v43 = vld [vmem:[#allocation5 + $0x454] ss:$12 sps:$4 sm:$0xff]   ;;  %v3226_v44 = vld [vmem:[#allocation5 + $0x450] ss:$12 sps:$4 sm:$0xff]  }
  0x61   :  { %1329 = vmatprep.subr.bf16.mxu1 %v3139_v45  ;;  %v3229_v45 = vld [vmem:[#allocation5 + $0x158] ss:$12 sps:$4 sm:$0xff]  }
  0x63   :  { %1287 = vmatpush2.bf16.msra.mxu0 %v3138_v46  ;;  %v3230_v46 = vld [vmem:[#allocation5 + $0x98] ss:$12 sps:$4 sm:$0xff]  }
  0x64   :  { %1288 = vmatprep.subr.bf16.mxu0 %v3142_v48  ;;  %1330 = vmatpush2.bf16.msra.mxu1 %v3141_v49  ;;  %v3233_v48 = vld [vmem:[#allocation5 + $0x43c] ss:$12 sps:$4 sm:$0xff]   ;;  %v3231_v49 = vld [vmem:[#allocation5 + $0x438] ss:$12 sps:$4 sm:$0xff]  }
  0x65   :  { %1331 = vmatprep.subr.bf16.mxu1 %v3145_v50  ;;  %v3234_v50 = vld [vmem:[#allocation5 + $0x140] ss:$12 sps:$4 sm:$0xff]  }
  0x67   :  { %1289 = vmatpush2.bf16.msra.mxu0 %v3144_v52  ;;  %v3235_v52 = vld [vmem:[#allocation5 + $0x80] ss:$12 sps:$4 sm:$0xff]  }
  0x68   :  { %1290 = vmatprep.subr.bf16.mxu0 %v3148_v53  ;;  %1332 = vmatpush2.bf16.msra.mxu1 %v3147_v54  ;;  %v3238_v53 = vld [vmem:[#allocation5 + $0x424] ss:$12 sps:$4 sm:$0xff]   ;;  %v3236_v54 = vld [vmem:[#allocation5 + $0x420] ss:$12 sps:$4 sm:$0xff]  }
  0x69   :  { %1333 = vmatprep.subr.bf16.mxu1 %v3151_v55  ;;  %v3239_v55 = vld [vmem:[#allocation5 + $0x128] ss:$12 sps:$4 sm:$0xff]  }
  0x6b   :  { %1291 = vmatpush2.bf16.msra.mxu0 %v3150_v56  ;;  %v3240_v56 = vld [vmem:[#allocation5 + $0x68] ss:$12 sps:$4 sm:$0xff]  }
  0x6c   :  { %1292 = vmatprep.subr.bf16.mxu0 %v3154_v57  ;;  %1334 = vmatpush2.bf16.msra.mxu1 %v3153_v58  ;;  %v3243_v57 = vld [vmem:[#allocation5 + $0x40c] ss:$12 sps:$4 sm:$0xff]   ;;  %v3241_v58 = vld [vmem:[#allocation5 + $0x408] ss:$12 sps:$4 sm:$0xff]  }
  0x6d   :  { %1335 = vmatprep.subr.bf16.mxu1 %v3157_v59  ;;  %v3244_v59 = vld [vmem:[#allocation5 + $0x110] ss:$12 sps:$4 sm:$0xff]  }
  0x6f   :  { %1293 = vmatpush2.bf16.msra.mxu0 %v3156_v60  ;;  %v3248_v60 = vld [vmem:[#allocation5 + $0x3f4] ss:$12 sps:$4 sm:$0xff]  }
  0x70   :  { %1294 = vmatprep.subr.bf16.mxu0 %v3160_v61  ;;  %1336 = vmatpush2.bf16.msra.mxu1 %v3159_v62  ;;  %v3246_v61 = vld [vmem:[#allocation5 + $0x3f0] ss:$12 sps:$4 sm:$0xff]   ;;  %v3249_v62 = vld [vmem:[#allocation5 + $0xf8] ss:$12 sps:$4 sm:$0xff]  }
  0x71   :  { %1337 = vmatprep.subr.bf16.mxu1 %v3163_v63  ;;  %v3250_v63 = vld [vmem:[#allocation5 + $0x38] ss:$12 sps:$4 sm:$0xff]  }
  0x73   :  { %1295 = vmatpush2.bf16.msra.mxu0 %v3162_v0  ;;  %v3253_v0 = vld [vmem:[#allocation5 + $0x3dc] ss:$12 sps:$4 sm:$0xff]  }
  0x74   :  { %1350 = vmatprep.subr.bf16.mxu0 %v3171_v1  ;;  %1338 = vmatpush2.bf16.msra.mxu1 %v3168_v2  ;;  %v3251_v1 = vld [vmem:[#allocation5 + $0x3d8] ss:$12 sps:$4 sm:$0xff]   ;;  %v3254_v2 = vld [vmem:[#allocation5 + $0xe0] ss:$12 sps:$4 sm:$0xff]  }
  0x75   :  { %1393 = vmatprep.subr.bf16.mxu1 %v3177_v4  ;;  %v3255_v4 = vld [vmem:[#allocation5 + $0x20] ss:$12 sps:$4 sm:$0xff]  }
  0x76   :  { %1297 = vmatmul.mubr.bf16.vlgmr.msra.gmra.mxu0 %v3612_v3 }
  0x77   :  { %1351 = vmatpush1.bf16.msra.mxu0 %v3169_v5  ;;  %1340 = vmatmul.mubr.bf16.vlgmr.msra.gmra.mxu1 %v3614_v6  ;;  %v3258_v5 = vld [vmem:[#allocation5 + $0x3c4] ss:$12 sps:$4 sm:$0xff]  }
  0x78   :  { %1352 = vmatprep.subr.bf16.mxu0 %v3180_v7  ;;  %1394 = vmatpush1.bf16.msra.mxu1 %v3175_v8  ;;  %v3256_v7 = vld [vmem:[#allocation5 + $0x3c0] ss:$12 sps:$4 sm:$0xff]   ;;  %v3259_v8 = vld [vmem:[#allocation5 + $0xc8] ss:$12 sps:$4 sm:$0xff]  }
  0x79   :  { %1425 = vmatprep.mubr.bf16.mxu1 %v3542_v13  ;;  %1395 = vmatprep.subr.bf16.mxu1 %v3183_v9  ;;  %v3263_v9 = vld [vmem:[#allocation5 + $0x8] ss:$12 sps:$4 sm:$0xff]  }
  0x7a   :  { %1382 = vmatprep.mubr.bf16.mxu0 %v3621_v41 }
  0x7b   :  { %1353 = vmatpush1.bf16.msra.mxu0 %v3178_v10  ;;  %v3626_v10 = vld [vmem:[#allocation2 + $0x10] ss:$28 sps:$4 sm:$0xff]  }
  0x7c   :  { %1354 = vmatprep.subr.bf16.mxu0 %v3186_v11  ;;  %1396 = vmatpush1.bf16.msra.mxu1 %v3181_v12  ;;  %v3264_v11 = vld [vmem:[#allocation5 + $0x2f0] ss:$12 sps:$4 sm:$0xff]  }
  0x7d   :  { %1397 = vmatprep.subr.bf16.mxu1 %v3189_v14  ;;  %v3265_v12 = vld [vmem:[#allocation5 + $0x230] ss:$12 sps:$4 sm:$0xff]  }
  0x7e   :  { %v3266_v14 = vld [vmem:[#allocation5 + $0x470] ss:$12 sps:$4 sm:$0xff]  }
  0x7f   :  { %1355 = vmatpush1.bf16.msra.mxu0 %v3184_v15  ;;  %v3267_v15 = vld [vmem:[#allocation5 + $0x3b0] ss:$12 sps:$4 sm:$0xff]  }
  0x80   :  { %1356 = vmatprep.subr.bf16.mxu0 %v3192_v16  ;;  %1398 = vmatpush1.bf16.msra.mxu1 %v3187_v17  ;;  %v3268_v16 = vld [vmem:[#allocation5 + $0x2d8] ss:$12 sps:$4 sm:$0xff]  }
  0x81   :  { %1399 = vmatprep.subr.bf16.mxu1 %v3195_v18  ;;  %v3269_v17 = vld [vmem:[#allocation5 + $0x218] ss:$12 sps:$4 sm:$0xff]  }
  0x82   :  { %v3270_v18 = vld [vmem:[#allocation5 + $0x458] ss:$12 sps:$4 sm:$0xff]  }
  0x83   :  { %1357 = vmatpush1.bf16.msra.mxu0 %v3190_v19  ;;  %v3271_v19 = vld [vmem:[#allocation5 + $0x398] ss:$12 sps:$4 sm:$0xff]  }
  0x84   :  { %1358 = vmatprep.subr.bf16.mxu0 %v3198_v20  ;;  %1400 = vmatpush1.bf16.msra.mxu1 %v3193_v21  ;;  %v3272_v20 = vld [vmem:[#allocation5 + $0x2c0] ss:$12 sps:$4 sm:$0xff]  }
  0x85   :  { %1401 = vmatprep.subr.bf16.mxu1 %v3201_v22  ;;  %v3273_v21 = vld [vmem:[#allocation5 + $0x200] ss:$12 sps:$4 sm:$0xff]  }
  0x86   :  { %v3274_v22 = vld [vmem:[#allocation5 + $0x440] ss:$12 sps:$4 sm:$0xff]  }
  0x87   :  { %1359 = vmatpush1.bf16.msra.mxu0 %v3196_v23  ;;  %v3275_v23 = vld [vmem:[#allocation5 + $0x380] ss:$12 sps:$4 sm:$0xff]  }
  0x88   :  { %1360 = vmatprep.subr.bf16.mxu0 %v3204_v24  ;;  %1402 = vmatpush1.bf16.msra.mxu1 %v3199_v25  ;;  %v3276_v24 = vld [vmem:[#allocation5 + $0x2a8] ss:$12 sps:$4 sm:$0xff]  }
  0x89   :  { %1403 = vmatprep.subr.bf16.mxu1 %v3207_v26  ;;  %v3278_v25 = vld [vmem:[#allocation5 + $0x428] ss:$12 sps:$4 sm:$0xff]  }
  0x8a   :  { %v3277_v26 = vld [vmem:[#allocation5 + $0x1e8] ss:$12 sps:$4 sm:$0xff]  }
  0x8b   :  { %1361 = vmatpush1.bf16.msra.mxu0 %v3202_v27  ;;  %v3282_v27 = vld [vmem:[#allocation5 + $0x410] ss:$12 sps:$4 sm:$0xff]  }
  0x8c   :  { %1362 = vmatprep.subr.bf16.mxu0 %v3210_v28  ;;  %1404 = vmatpush1.bf16.msra.mxu1 %v3205_v29  ;;  %v3281_v28 = vld [vmem:[#allocation5 + $0x1d0] ss:$12 sps:$4 sm:$0xff]   ;;  %v3284_v29 = vld [vmem:[#allocation5 + $0x278] ss:$12 sps:$4 sm:$0xff]  }
  0x8d   :  { %1405 = vmatprep.subr.bf16.mxu1 %v3213_v30  ;;  %v3283_v30 = vld [vmem:[#allocation5 + $0x350] ss:$12 sps:$4 sm:$0xff]  }
  0x8f   :  { %1363 = vmatpush1.bf16.msra.mxu0 %v3208_v31  ;;  %v3286_v31 = vld [vmem:[#allocation5 + $0x3f8] ss:$12 sps:$4 sm:$0xff]  }
  0x90   :  { %1364 = vmatprep.subr.bf16.mxu0 %v3216_v33  ;;  %1406 = vmatpush1.bf16.msra.mxu1 %v3211_v32  ;;  %v3285_v32 = vld [vmem:[#allocation5 + $0x1b8] ss:$12 sps:$4 sm:$0xff]  }
  0x91   :  { %1407 = vmatprep.subr.bf16.mxu1 %v3219_v35  ;;  %v3287_v33 = vld [vmem:[#allocation5 + $0x338] ss:$12 sps:$4 sm:$0xff]   ;;  %v3289_v35 = vld [vmem:[#allocation5 + $0x1a0] ss:$12 sps:$4 sm:$0xff]  }
  0x93   :  { %1365 = vmatpush1.bf16.msra.mxu0 %v3214_v34  ;;  %v3288_v34 = vld [vmem:[#allocation5 + $0x260] ss:$12 sps:$4 sm:$0xff]  }
  0x94   :  { %1366 = vmatprep.subr.bf16.mxu0 %v3222_v37  ;;  %1408 = vmatpush1.bf16.msra.mxu1 %v3217_v36  ;;  %v3290_v36 = vld [vmem:[#allocation5 + $0x3e0] ss:$12 sps:$4 sm:$0xff]   ;;  %v3292_v37 = vld [vmem:[#allocation5 + $0x248] ss:$12 sps:$4 sm:$0xff]  }
  0x95   :  { %2857 = vmatprep.subr.bf16.mxu1 %v3223_v39  ;;  %v3294_v39 = vld [vmem:[#allocation5 + $0x3c8] ss:$12 sps:$4 sm:$0xff]  }
  0x97   :  { %1367 = vmatpush2.bf16.msra.mxu0 %v3220_v38  ;;  %1426 = vmatmul.mubr.bf16.vlgmr.msra.gmra.mxu1 %v3619_v40  ;;  %v3291_v38 = vld [vmem:[#allocation5 + $0x320] ss:$12 sps:$4 sm:$0xff]  }
  0x98   :  { %1368 = vmatprep.subr.bf16.mxu0 %v3228_v43  ;;  %2858 = vmatpush3.bf16.msra.mxu1 %v3225_v42  ;;  %v3295_v42 = vld [vmem:[#allocation5 + $0x308] ss:$12 sps:$4 sm:$0xff]   ;;  %v3306_v43 = vld [vmem:[#allocation7 + $0xac] ss:$12 sps:$4 sm:$0xff]  }
  0x99   :  { %1468 = vmatprep.mubr.bf16.mxu1 %v3606_v47  ;;  %2859 = vmatprep.subr.bf16.mxu1 %v3229_v45  ;;  %v3245_v47 = vld [vmem:[#allocation5 + $0x50] ss:$12 sps:$4 sm:$0xff]   ;;  %v3304_v45 = vld [vmem:[#allocation7 + $0xa8] ss:$12 sps:$4 sm:$0xff]  }
  0x9b   :  { %1369 = vmatpush2.bf16.msra.mxu0 %v3226_v44  ;;  %v3296_v44 = vld [vmem:[#allocation5 + $0x530] ss:$12 sps:$4 sm:$0xff]  }
  0x9c   :  { %1370 = vmatprep.subr.bf16.mxu0 %v3233_v48  ;;  %2860 = vmatpush3.bf16.msra.mxu1 %v3230_v46  ;;  %v3543_v46 = vmov 0.0   ;;  %v3309_v48 = vld [vmem:[#allocation7 + $0x94] ss:$12 sps:$4 sm:$0xff]  }
  0x9d   :  { %2861 = vmatprep.subr.bf16.mxu1 %v3234_v50  ;;  %v3307_v50 = vld [vmem:[#allocation7 + $0x90] ss:$12 sps:$4 sm:$0xff]  }
  0x9f   :  { %1371 = vmatpush2.bf16.msra.mxu0 %v3231_v49  ;;  %v3297_v49 = vld [vmem:[#allocation5 + $0x518] ss:$12 sps:$4 sm:$0xff]  }
  0xa0   :  { %1372 = vmatprep.subr.bf16.mxu0 %v3238_v53  ;;  %2862 = vmatpush3.bf16.msra.mxu1 %v3235_v52  ;;  %v3298_v52 = vld [vmem:[#allocation5 + $0x500] ss:$12 sps:$4 sm:$0xff]   ;;  %v3312_v53 = vld [vmem:[#allocation7 + $0x7c] ss:$12 sps:$4 sm:$0xff]  }
  0xa1   :  { %2863 = vmatprep.subr.bf16.mxu1 %v3239_v55  ;;  %v3315_v55 = vld [vmem:[#allocation7 + $0x64] ss:$12 sps:$4 sm:$0xff]  }
  0xa3   :  { %1373 = vmatpush2.bf16.msra.mxu0 %v3236_v54  ;;  %v3310_v54 = vld [vmem:[#allocation7 + $0x78] ss:$12 sps:$4 sm:$0xff]  }
  0xa4   :  { %1374 = vmatprep.subr.bf16.mxu0 %v3243_v57  ;;  %2864 = vmatpush3.bf16.msra.mxu1 %v3240_v56  ;;  %v3313_v56 = vld [vmem:[#allocation7 + $0x60] ss:$12 sps:$4 sm:$0xff]  }
  0xa5   :  { %2865 = vmatprep.subr.bf16.mxu1 %v3244_v59  ;;  %v3318_v57 = vld [vmem:[#allocation7 + $0x4c] ss:$12 sps:$4 sm:$0xff]   ;;  %v3316_v59 = vld [vmem:[#allocation7 + $0x48] ss:$12 sps:$4 sm:$0xff]  }
  0xa7   :  { %1375 = vmatpush2.bf16.msra.mxu0 %v3241_v58  ;;  %v3300_v58 = vld [vmem:[#allocation5 + $0x4d0] ss:$12 sps:$4 sm:$0xff]  }
  0xa8   :  { %1376 = vmatprep.subr.bf16.mxu0 %v3248_v60  ;;  %2866 = vmatpush3.bf16.msra.mxu1 %v3245_v47  ;;  %v3321_v47 = vld [vmem:[#allocation7 + $0x34] ss:$12 sps:$4 sm:$0xff]   ;;  %v3301_v60 = vld [vmem:[#allocation5 + $0x4b8] ss:$12 sps:$4 sm:$0xff]  }
  0xa9   :  { %2867 = vmatprep.subr.bf16.mxu1 %v3249_v62  ;;  %v3324_v62 = vld [vmem:[#allocation7 + $0x1c] ss:$12 sps:$4 sm:$0xff]  }
  0xab   :  { %1377 = vmatpush2.bf16.msra.mxu0 %v3246_v61  ;;  %v3319_v61 = vld [vmem:[#allocation7 + $0x30] ss:$12 sps:$4 sm:$0xff]  }
  0xac   :  { %1378 = vmatprep.subr.bf16.mxu0 %v3253_v0  ;;  %2868 = vmatpush3.bf16.msra.mxu1 %v3250_v63  ;;  %v3302_v63 = vld [vmem:[#allocation5 + $0x4a0] ss:$12 sps:$4 sm:$0xff]   ;;  %v3322_v0 = vld [vmem:[#allocation7 + $0x18] ss:$12 sps:$4 sm:$0xff]  }
  0xad   :  { %2869 = vmatprep.subr.bf16.mxu1 %v3254_v2  ;;  %v3303_v2 = vld [vmem:[#allocation5 + $0x488] ss:$12 sps:$4 sm:$0xff]  }
  0xaf   :  { %1379 = vmatpush2.bf16.msra.mxu0 %v3251_v1  ;;  %v3327_v1 = vld [vmem:[#allocation7 + $0x4] ss:$12 sps:$4 sm:$0xff]  }
  0xb0   :  { %1380 = vmatprep.subr.bf16.mxu0 %v3258_v5  ;;  %2870 = vmatpush3.bf16.msra.mxu1 %v3255_v4  ;;  %v3325_v4 = vld [vmem:[#allocation7] ss:$12 sps:$4 sm:$0xff]  }
  0xb1   :  { %2871 = vmatprep.subr.bf16.mxu1 %v3259_v8  ;;  %v3330_v5 = vld [vmem:[#allocation7 + $0x16c] ss:$12 sps:$4 sm:$0xff]   ;;  %v3333_v8 = vld [vmem:[#allocation7 + $0x154] ss:$12 sps:$4 sm:$0xff]  }
  0xb3   :  { %1381 = vmatpush2.bf16.msra.mxu0 %v3256_v7  ;;  %v3328_v7 = vld [vmem:[#allocation7 + $0x168] ss:$12 sps:$4 sm:$0xff]  }
  0xb4   :  { %2879 = vmatprep.subr.bf16.mxu0 %v3264_v11  ;;  %2872 = vmatpush3.bf16.msra.mxu1 %v3263_v9  ;;  %v3331_v9 = vld [vmem:[#allocation7 + $0x150] ss:$12 sps:$4 sm:$0xff]   ;;  %v3334_v11 = vld [vmem:[#allocation7 + $0x138] ss:$12 sps:$4 sm:$0xff]  }
  0xb5   :  { %2901 = vmatprep.subr.bf16.mxu1 %v3266_v14  ;;  %v3337_v14 = vld [vmem:[#allocation7 + $0x120] ss:$12 sps:$4 sm:$0xff]  }
  0xb6   :  { %1383 = vmatmul.mubr.bf16.vlgmr.msra.gmra.mxu0 %v3626_v10 }
  0xb7   :  { %2880 = vmatpush3.bf16.msra.mxu0 %v3265_v12  ;;  %1509 = vmatprep.mubr.bf16.mxu0 %v3609_v51  ;;  %v3280_v51 = vld [vmem:[#allocation5 + $0x290] ss:$12 sps:$4 sm:$0xff]  }
  0xb8   :  { %1469 = vmatmul.mubr.bf16.vlgmr.msra.gmra.mxu1 %v3612_v3  ;;  %2881 = vmatprep.subr.bf16.mxu0 %v3268_v16  ;;  %v3279_v3 = vld [vmem:[#allocation5 + $0x368] ss:$12 sps:$4 sm:$0xff]   ;;  %v3339_v12 = vld [vmem:[#allocation7 + $0x124] ss:$12 sps:$4 sm:$0xff]  }
  0xb9   :  { %2902 = vmatpush3.bf16.msra.mxu1 %v3267_v15  ;;  %1550 = vmatprep.mubr.bf16.mxu1 %v3621_v41  ;;  %v3293_v41 = vld [vmem:[#allocation5 + $0x188] ss:$12 sps:$4 sm:$0xff]   ;;  %v3342_v15 = vld [vmem:[#allocation7 + $0x10c] ss:$12 sps:$4 sm:$0xff]  }
  0xba   :  { %2903 = vmatprep.subr.bf16.mxu1 %v3270_v18  ;;  %v3340_v16 = vld [vmem:[#allocation7 + $0x108] ss:$12 sps:$4 sm:$0xff]   ;;  %v3346_v18 = vld [vmem:[#allocation7 + $0xd8] ss:$12 sps:$4 sm:$0xff]  }
  0xbb   :  { %2882 = vmatpush3.bf16.msra.mxu0 %v3269_v17  ;;  %v3343_v17 = vld [vmem:[#allocation7 + $0xf0] ss:$12 sps:$4 sm:$0xff]  }
  0xbc   :  { %2883 = vmatprep.subr.bf16.mxu0 %v3272_v20  ;;  %v3349_v20 = vld [vmem:[#allocation7 + $0xc0] ss:$12 sps:$4 sm:$0xff]  }
  0xbd   :  { %2904 = vmatpush3.bf16.msra.mxu1 %v3271_v19  ;;  %v3351_v19 = vld [vmem:[#allocation7 + $0xc4] ss:$12 sps:$4 sm:$0xff]  }
  0xbe   :  { %2905 = vmatprep.subr.bf16.mxu1 %v3274_v22  ;;  %v3352_v22 = vld [vmem:[#allocation7 + $0x228] ss:$12 sps:$4 sm:$0xff]  }
  0xbf   :  { %2884 = vmatpush3.bf16.msra.mxu0 %v3273_v21  ;;  %v3354_v21 = vld [vmem:[#allocation7 + $0x22c] ss:$12 sps:$4 sm:$0xff]  }
  0xc0   :  { %2885 = vmatprep.subr.bf16.mxu0 %v3276_v24  ;;  %v3356_v24 = vld [vmem:[#allocation7 + $0x210] ss:$12 sps:$4 sm:$0xff]  }
  0xc1   :  { %2906 = vmatpush3.bf16.msra.mxu1 %v3275_v23  ;;  %v3358_v23 = vld [vmem:[#allocation7 + $0x214] ss:$12 sps:$4 sm:$0xff]  }
  0xc2   :  { %2907 = vmatprep.subr.bf16.mxu1 %v3278_v25  ;;  %v3362_v25 = vld [vmem:[#allocation7 + $0x1fc] ss:$12 sps:$4 sm:$0xff]  }
  0xc3   :  { %2886 = vmatpush3.bf16.msra.mxu0 %v3277_v26  ;;  %v3360_v26 = vld [vmem:[#allocation7 + $0x1f8] ss:$12 sps:$4 sm:$0xff]  }
  0xc4   :  { %2887 = vmatprep.subr.bf16.mxu0 %v3280_v51  ;;  %v3366_v51 = vld [vmem:[#allocation7 + $0x1e4] ss:$12 sps:$4 sm:$0xff]  }
  0xc5   :  { %2908 = vmatpush3.bf16.msra.mxu1 %v3279_v3  ;;  %v3364_v3 = vld [vmem:[#allocation7 + $0x1e0] ss:$12 sps:$4 sm:$0xff]  }
  0xc6   :  { %2909 = vmatprep.subr.bf16.mxu1 %v3282_v27  ;;  %v3370_v27 = vld [vmem:[#allocation7 + $0x1cc] ss:$12 sps:$4 sm:$0xff]  }
  0xc7   :  { %2888 = vmatpush3.bf16.msra.mxu0 %v3281_v28  ;;  %v3368_v28 = vld [vmem:[#allocation7 + $0x1c8] ss:$12 sps:$4 sm:$0xff]  }
  0xc8   :  { %2889 = vmatprep.subr.bf16.mxu0 %v3284_v29  ;;  %v3374_v29 = vld [vmem:[#allocation7 + $0x1b4] ss:$12 sps:$4 sm:$0xff]  }
  0xc9   :  { %2910 = vmatpush3.bf16.msra.mxu1 %v3283_v30  ;;  %v3372_v30 = vld [vmem:[#allocation7 + $0x1b0] ss:$12 sps:$4 sm:$0xff]  }
  0xca   :  { %2911 = vmatprep.subr.bf16.mxu1 %v3286_v31  ;;  %v3378_v31 = vld [vmem:[#allocation7 + $0x19c] ss:$12 sps:$4 sm:$0xff]  }
  0xcb   :  { %2890 = vmatpush3.bf16.msra.mxu0 %v3285_v32  ;;  %v3376_v32 = vld [vmem:[#allocation7 + $0x198] ss:$12 sps:$4 sm:$0xff]  }
  0xcc   :  { %2891 = vmatprep.subr.bf16.mxu0 %v3288_v34  ;;  %v3380_v34 = vld [vmem:[#allocation7 + $0x180] ss:$12 sps:$4 sm:$0xff]  }
  0xcd   :  { %2912 = vmatpush3.bf16.msra.mxu1 %v3287_v33  ;;  %v3382_v33 = vld [vmem:[#allocation7 + $0x184] ss:$12 sps:$4 sm:$0xff]  }
  0xce   :  { %2913 = vmatprep.subr.bf16.mxu1 %v3290_v36  ;;  %v317_v36 = vlaneseq }
  0xcf   :  { %2892 = vmatpush3.bf16.msra.mxu0 %v3289_v35  ;;  %v3384_v35 = vld [vmem:[#allocation7 + $0x170] ss:$12 sps:$4 sm:$0xff]  }
  0xd0   :  { %2893 = vmatprep.subr.bf16.mxu0 %v3292_v37 }
  0xd1   :  { %2914 = vmatpush3.bf16.msra.mxu1 %v3291_v38  ;;  %v3647_v38 = vshrl.u32 %v317_v36, 7 }
  0xd2   :  { %2915 = vmatprep.subr.bf16.mxu1 %v3294_v39 }
  0xd3   :  { %2894 = vmatpush3.bf16.msra.mxu0 %v3293_v41 }
  0xd4   :  { %2994 = vmatprep.subr.bf16.mxu0 %v3543_v46 }
  0xd5   :  { %2916 = vmatpush3.bf16.msra.mxu1 %v3295_v42  ;;  %v323_v42 = vsub.s32 1, %v3647_v38 }
  0xd6   :  { %1510 = vmatmul.mubr.bf16.vlgmr.msra.gmra.mxu0 %v3614_v6  ;;  %2106 = vmatprep.subr.bf16.mxu1 %v3306_v43  ;;  %v3299_v6 = vld [vmem:[#allocation5 + $0x4e8] ss:$12 sps:$4 sm:$0xff]  }
  0xd7   :  { %2995 = vmatpush3.bf16.msra.mxu0 %v3296_v44  ;;  %3010 = vmatprep.mubr.msk.bf16.mxu0 %vm3544_vm0, %v3543_v46  ;;  %v3653_v43 = vld [vmem:[%s3710_s2] sm:$0x7]  ;;  %v319_v44 = vsub.s32 0, %v3647_v38 }
  0xd8   :  { %1551 = vmatmul.mubr.bf16.vlgmr.msra.gmra.mxu1 %v3626_v10  ;;  %2996 = vmatprep.subr.bf16.mxu0 %v3543_v46  ;;  %v3336_v10 = vld [vmem:[#allocation7 + $0x13c] ss:$12 sps:$4 sm:$0xff]  }
  0xd9   :  { %2107 = vmatpush1.bf16.msra.mxu1 %v3304_v45 }
  0xda   :  { %2108 = vmatprep.subr.bf16.mxu1 %v3309_v48 }
  0xdb   :  { %2997 = vmatpush3.bf16.msra.mxu0 %v3297_v49  ;;  %v324_v49 = vrot.slane %v3653_v43, %v323_v42 }
  0xdc   :  { %2998 = vmatprep.subr.bf16.mxu0 %v3543_v46 }
  0xdd   :  { %2109 = vmatpush1.bf16.msra.mxu1 %v3307_v50  ;;  %v320_v50 = vrot.slane %v3653_v43, %v319_v44 }
  0xde   :  { %2110 = vmatprep.subr.bf16.mxu1 %v3312_v53 }
  0xdf   :  { %2999 = vmatpush3.bf16.msra.mxu0 %v3298_v52 }
  0xe0   :  { %3000 = vmatprep.subr.bf16.mxu0 %v3543_v46 }
  0xe1   :  { %2111 = vmatpush1.bf16.msra.mxu1 %v3310_v54 }
  0xe2   :  { %2112 = vmatprep.subr.bf16.mxu1 %v3315_v55 }
  0xe3   :  { %3001 = vmatpush3.bf16.msra.mxu0 %v3299_v6 }
  0xe4   :  { %3002 = vmatprep.subr.bf16.mxu0 %v3543_v46 }
  0xe5   :  { %2113 = vmatpush1.bf16.msra.mxu1 %v3313_v56 }
  0xe6   :  { %2114 = vmatprep.subr.bf16.mxu1 %v3318_v57 }
  0xe7   :  { %3003 = vmatpush3.bf16.msra.mxu0 %v3300_v58 }
  0xe8   :  { %3004 = vmatprep.subr.bf16.mxu0 %v3543_v46 }
  0xe9   :  { %2115 = vmatpush1.bf16.msra.mxu1 %v3316_v59 }
  0xea   :  { %2116 = vmatprep.subr.bf16.mxu1 %v3321_v47 }
  0xeb   :  { %3005 = vmatpush3.bf16.msra.mxu0 %v3301_v60 }
  0xec   :  { %3006 = vmatprep.subr.bf16.mxu0 %v3543_v46 }
  0xed   :  { %2117 = vmatpush1.bf16.msra.mxu1 %v3319_v61 }
  0xee   :  { %2118 = vmatprep.subr.bf16.mxu1 %v3324_v62 }
  0xef   :  { %3007 = vmatpush3.bf16.msra.mxu0 %v3302_v63 }
  0xf0   :  { %3008 = vmatprep.subr.bf16.mxu0 %v3543_v46 }
  0xf1   :  { %2119 = vmatpush1.bf16.msra.mxu1 %v3322_v0 }
  0xf2   :  { %2120 = vmatprep.subr.bf16.mxu1 %v3327_v1 }
  0xf3   :  { %3009 = vmatpush3.bf16.msra.mxu0 %v3303_v2 }
  0xf4   :  { %2149 = vmatprep.subr.bf16.mxu0 %v3354_v21  ;;  %v3359_v21 = vld [vmem:[#allocation7 + $0x218] ss:$12 sps:$4 sm:$0xff]  }
  0xf5   :  { %2121 = vmatpush1.bf16.msra.mxu1 %v3325_v4 }
  0xf6   :  { %3011 = vmatmul.mubr.bf16.vlgmr.msra.gmra.mxu0 %v3619_v40  ;;  %2122 = vmatprep.subr.bf16.mxu1 %v3330_v5  ;;  %v3345_v40 = vld [vmem:[#allocation7 + $0xf4] ss:$12 sps:$4 sm:$0xff]  }
  0xf7   :  { %2181 = vmatprep.mubr.bf16.mxu0 %v3542_v13  ;;  %v3348_v13 = vld [vmem:[#allocation7 + $0xdc] ss:$12 sps:$4 sm:$0xff]   ;;  %2150 = vmatpush1.bf16.msra.mxu0 %v3352_v22  ;;  %v3363_v22 = vld [vmem:[#allocation7 + $0x200] ss:$12 sps:$4 sm:$0xff]  }
  0xf8   :  { %2151 = vmatprep.subr.bf16.mxu0 %v3358_v23  ;;  %v3367_v23 = vld [vmem:[#allocation7 + $0x1e8] ss:$12 sps:$4 sm:$0xff]  }
  0xf9   :  { %2123 = vmatpush2.bf16.msra.mxu1 %v3328_v7 }
  0xfa   :  { %2124 = vmatprep.subr.bf16.mxu1 %v3333_v8 }
  0xfb   :  { %2152 = vmatpush1.bf16.msra.mxu0 %v3356_v24  ;;  %v3371_v24 = vld [vmem:[#allocation7 + $0x1d0] ss:$12 sps:$4 sm:$0xff]  }
  0xfc   :  { %2153 = vmatprep.subr.bf16.mxu0 %v3362_v25  ;;  %v3375_v25 = vld [vmem:[#allocation7 + $0x1b8] ss:$12 sps:$4 sm:$0xff]  }
  0xfd   :  { %2125 = vmatpush2.bf16.msra.mxu1 %v3331_v9 }
  0xfe   :  { %2126 = vmatprep.subr.bf16.mxu1 %v3336_v10 }
  0xff   :  { %2154 = vmatpush1.bf16.msra.mxu0 %v3360_v26 }
 0x100   :  { %2155 = vmatprep.subr.bf16.mxu0 %v3366_v51  ;;  %v3379_v51 = vld [vmem:[#allocation7 + $0x1a0] ss:$12 sps:$4 sm:$0xff]  }
 0x101   :  { %2127 = vmatpush2.bf16.msra.mxu1 %v3334_v11 }
 0x102   :  { %2128 = vmatprep.subr.bf16.mxu1 %v3339_v12 }
 0x103   :  { %2156 = vmatpush1.bf16.msra.mxu0 %v3364_v3 }
 0x104   :  { %2157 = vmatprep.subr.bf16.mxu0 %v3370_v27  ;;  %v3383_v27 = vld [vmem:[#allocation7 + $0x188] ss:$12 sps:$4 sm:$0xff]  }
 0x105   :  { %2129 = vmatpush2.bf16.msra.mxu1 %v3337_v14 }
 0x106   :  { %2130 = vmatprep.subr.bf16.mxu1 %v3342_v15 }
 0x107   :  { %2158 = vmatpush1.bf16.msra.mxu0 %v3368_v28 }
 0x108   :  { %2159 = vmatprep.subr.bf16.mxu0 %v3374_v29 }
 0x109   :  { %2131 = vmatpush2.bf16.msra.mxu1 %v3340_v16 }
 0x10a   :  { %2132 = vmatprep.subr.bf16.mxu1 %v3345_v40 }
 0x10b   :  { %2160 = vmatpush1.bf16.msra.mxu0 %v3372_v30 }
 0x10c   :  { %2161 = vmatprep.subr.bf16.mxu0 %v3378_v31 }
 0x10d   :  { %2133 = vmatpush2.bf16.msra.mxu1 %v3343_v17 }
 0x10e   :  { %2134 = vmatprep.subr.bf16.mxu1 %v3348_v13 }
 0x10f   :  { %2162 = vmatpush1.bf16.msra.mxu0 %v3376_v32 }
 0x110   :  { %2163 = vmatprep.subr.bf16.mxu0 %v3382_v33  ;;  %v327_v33 = vsub.s32 2, %v3647_v38  ;;  %v2832_v38 = vld [vmem:[%s3714_s6] ss:$0 sm:$0xff] }
 0x111   :  { %2135 = vmatpush2.bf16.msra.mxu1 %v3346_v18 }
 0x112   :  { %2136 = vmatprep.subr.bf16.mxu1 %v3351_v19  ;;  %v3355_v19 = vld [vmem:[#allocation7 + $0x230] ss:$12 sps:$4 sm:$0xff]   ;;  %v328_v36 = vrot.slane %v3653_v43, %v327_v33 }
 0x113   :  { %2164 = vmatpush1.bf16.msra.mxu0 %v3380_v34 }
 0x114   :  { %2932 = vmatprep.subr.bf16.mxu0 %v3384_v35 }
 0x115   :  { %2137 = vmatpush2.bf16.msra.mxu1 %v3349_v20 }
 0x116   :  { %3014 = vmatprep.subr.bf16.mxu1 %v3543_v46 }
 0x136   :  { %v1298_v39 = vpop.f32.mrf.mxu0 }
 0x137   :  { %v1341_v37 = vpop.f32.mrf.mxu1  ;;  %v1299_v55 = vadd.f32 %v1298_v39, %v320_v50 }
 0x138   :  { %v1300_v45 = vpop.f32.mrf.mxu0 }
 0x139   :  { %v1343_v41 = vpop.f32.mrf.mxu1  ;;  %v1301_v6 = vadd.f32 %v1300_v45, %v324_v49  ;;  %v1342_v61 = vadd.f32 %v1341_v37, %v1299_v55 }
 0x13a   :  { %v1302_v52 = vpop.f32.mrf.mxu0 }
 0x13b   :  { %v1345_v48 = vpop.f32.mrf.mxu1  ;;  %v1303_v57 = vadd.f32 %v1302_v52, %v320_v50  ;;  %v1344_v47 = vadd.f32 %v1343_v41, %v1301_v6 }
 0x13c   :  { %v1304_v56 = vpop.f32.mrf.mxu0 }
 0x13d   :  { %v1347_v53 = vpop.f32.mrf.mxu1  ;;  %v1305_v60 = vadd.f32 %v1304_v56, %v324_v49  ;;  %v1346_v63 = vadd.f32 %v1345_v48, %v1303_v57 }
 0x13f   :  { %v1348_v5 = vadd.f32 %v1347_v53, %v1305_v60 }
 0x157   :  { %v1427_v54 = vpop.f32.mrf.mxu1 }
 0x159   :  { %v1429_v58 = vpop.f32.mrf.mxu1 }
 0x15b   :  { %v1431_v1 = vpop.f32.mrf.mxu1 }
 0x15d   :  { %v1433_v12 = vpop.f32.mrf.mxu1 }
 0x176   :  { %v1384_v59 = vpop.f32.mrf.mxu0 }
 0x177   :  { %v1385_v2 = vadd.f32 %v1384_v59, %v1342_v61 }
 0x178   :  { %v1386_v62 = vpop.f32.mrf.mxu0  ;;  %v2873_v26 = vpop.f32.mrf.mxu1 }
 0x179   :  { %v1387_v0 = vadd.f32 %v1386_v62, %v1344_v47  ;;  %v1428_v14 = vadd.f32 %v1427_v54, %v1385_v2 }
 0x17a   :  { %v1388_v4 = vpop.f32.mrf.mxu0  ;;  %v2874_v3 = vpop.f32.mrf.mxu1 }
 0x17b   :  { %v1389_v7 = vadd.f32 %v1388_v4, %v1346_v63  ;;  %v1430_v9 = vadd.f32 %v1429_v58, %v1387_v0  ;;  %v1600_v13 = vmax.f32 %v1428_v14, 0.0  ;;  %v2875_v37 = vadd.f32 %v2874_v3, %v2873_v26  ;;  %v3386_v4 = vld [vmem:[#allocation7 + $0x158] ss:$12 sps:$4 sm:$0xff]  }
 0x17c   :  { %v1390_v8 = vpop.f32.mrf.mxu0  ;;  %v2876_v28 = vpop.f32.mrf.mxu1  ;;  %v3394_v14 = vld [vmem:[#allocation7 + $0xf8] ss:$12 sps:$4 sm:$0xff]  }
 0x17d   :  { %v1432_v10 = vadd.f32 %v1431_v1, %v1389_v7  ;;  %v1391_v11 = vadd.f32 %v1390_v8, %v1348_v5  ;;  %v1601_v40 = vmax.f32 %v1430_v9, 0.0  ;;  %v1471_v49 = vadd.f32 %v2875_v37, %v328_v36  ;;  %v3385_v1 = vld [vmem:[#allocation7 + $0xb0] ss:$12 sps:$4 sm:$0xff]   ;;  %v3387_v5 = vld [vmem:[#allocation7 + $0x98] ss:$12 sps:$4 sm:$0xff]  }
 0x17e   :  { %v2877_v30 = vpop.f32.mrf.mxu1  ;;  %v3388_v7 = vld [vmem:[#allocation7 + $0x140] ss:$12 sps:$4 sm:$0xff]   ;;  %v3390_v9 = vld [vmem:[#allocation7 + $0x128] ss:$12 sps:$4 sm:$0xff]   ;;  %v3409_v3 = vld [vmem:[#allocation8 + $0x18] sm:$0xff]  }
 0x17f   :  { %v1434_v15 = vadd.f32 %v1433_v12, %v1391_v11  ;;  %v1603_v16 = vmax.f32 %v1432_v10, 0.0  ;;  %v2878_v45 = vadd.f32 %v2877_v30, %v2876_v28  ;;  %v3389_v8 = vld [vmem:[#allocation7 + $0x80] ss:$12 sps:$4 sm:$0xff]   ;;  %v3391_v10 = vld [vmem:[#allocation7 + $0x68] ss:$12 sps:$4 sm:$0xff]   ;;  %v3420_v37 = vld [vmem:[#allocation8 + $0x98] sm:$0xff]  }
 0x180   :  { %v3392_v11 = vld [vmem:[#allocation7 + $0x110] ss:$12 sps:$4 sm:$0xff]   ;;  %v3407_v26 = vld [vmem:[#allocation8 + $0x20] sm:$0xff]  }
 0x181   :  { %v1604_v17 = vmax.f32 %v1434_v15, 0.0  ;;  %v3664_v20 = vpack.c.bf16 %v1603_v16, %v1600_v13  ;;  %v1474_v53 = vadd.f32 %v2878_v45, %v328_v36  ;;  %v3393_v12 = vld [vmem:[#allocation7 + $0x50] ss:$12 sps:$4 sm:$0xff]   ;;  %v3395_v15 = vld [vmem:[#allocation7 + $0x38] ss:$12 sps:$4 sm:$0xff]  }
 0x182   :  { %v3396_v16 = vld [vmem:[#allocation7 + $0xe0] ss:$12 sps:$4 sm:$0xff]   ;;  %v3399_v13 = vld [vmem:[#allocation7 + $0x8] ss:$12 sps:$4 sm:$0xff]  }
 0x183   :  { %v3662_v18 = vpack.c.bf16 %v1604_v17, %v1601_v40  ;;  %v3397_v40 = vld [vmem:[#allocation7 + $0x20] ss:$12 sps:$4 sm:$0xff]   ;;  %v3398_v17 = vld [vmem:[#allocation7 + $0xc8] ss:$12 sps:$4 sm:$0xff]  }
 0x184   :  { %v3411_v28 = vld [vmem:[#allocation8 + $0x10] sm:$0xff]   ;;  %v3414_v30 = vld [vmem:[#allocation8 + $0x40] sm:$0xff]  }
 0x185   :  { %2138 = vmatprep.mubr.bf16.mxu1 %v3662_v18  ;;  %v3419_v36 = vld [vmem:[#allocation8 + $0xa0] sm:$0xff]  }
 0x186   :  { %2139 = vmatmul.mubr.bf16.vlgmr.msra.gmra.mxu1 %v3664_v20  ;;  %v3423_v45 = vld [vmem:[#allocation8 + $0x80] sm:$0xff]  }
 0x187   :  { %3015 = vmatpush3.bf16.msra.mxu1 %v3355_v19  ;;  %3030 = vmatprep.mubr.msk.bf16.mxu1 %vm3544_vm0, %v3543_v46  ;;  %v3401_v19 = vld [vmem:[#allocation8 + $0x38] sm:$0xff]  }
 0x188   :  { %3016 = vmatprep.subr.bf16.mxu1 %v3543_v46 }
 0x18b   :  { %3017 = vmatpush3.bf16.msra.mxu1 %v3359_v21  ;;  %v3402_v21 = vld [vmem:[#allocation8 + $0x70] sm:$0xff]  }
 0x18c   :  { %3018 = vmatprep.subr.bf16.mxu1 %v3543_v46 }
 0x18f   :  { %3019 = vmatpush3.bf16.msra.mxu1 %v3363_v22  ;;  %v3403_v22 = vld [vmem:[#allocation8 + $0x30] sm:$0xff]  }
 0x190   :  { %3020 = vmatprep.subr.bf16.mxu1 %v3543_v46 }
 0x193   :  { %3021 = vmatpush3.bf16.msra.mxu1 %v3367_v23  ;;  %v3404_v23 = vld [vmem:[#allocation8 + $0x68] sm:$0xff]  }
 0x194   :  { %3022 = vmatprep.subr.bf16.mxu1 %v3543_v46 }
 0x196   :  { %v2895_v29 = vpop.f32.mrf.mxu0 }
 0x197   :  { %3023 = vmatpush3.bf16.msra.mxu1 %v3371_v24  ;;  %v3405_v24 = vld [vmem:[#allocation8 + $0x28] sm:$0xff]  }
 0x198   :  { %3024 = vmatprep.subr.bf16.mxu1 %v3543_v46  ;;  %v2896_v31 = vpop.f32.mrf.mxu0  ;;  %v2917_v32 = vpop.f32.mrf.mxu1 }
 0x199   :  { %v2897_v48 = vadd.f32 %v2896_v31, %v2895_v29  ;;  %v3413_v29 = vld [vmem:[#allocation8 + $0x8] sm:$0xff]   ;;  %v3415_v31 = vld [vmem:[#allocation8] sm:$0xff]  }
 0x19a   :  { %v2898_v34 = vpop.f32.mrf.mxu0  ;;  %v2918_v35 = vpop.f32.mrf.mxu1 }
 0x19b   :  { %3025 = vmatpush3.bf16.msra.mxu1 %v3375_v25  ;;  %v1512_v54 = vadd.f32 %v2897_v48, %v1471_v49  ;;  %v2919_v6 = vadd.f32 %v2918_v35, %v2917_v32  ;;  %v3406_v25 = vld [vmem:[#allocation8 + $0x60] sm:$0xff]   ;;  %v3416_v32 = vld [vmem:[#allocation8 + $0xb8] sm:$0xff]   ;;  %v3418_v35 = vld [vmem:[#allocation8 + $0xa8] sm:$0xff]  }
 0x19c   :  { %3026 = vmatprep.subr.bf16.mxu1 %v3543_v46  ;;  %v2899_v39 = vpop.f32.mrf.mxu0  ;;  %v2920_v41 = vpop.f32.mrf.mxu1 }
 0x19d   :  { %v2900_v50 = vadd.f32 %v2899_v39, %v2898_v34  ;;  %v1553_v58 = vadd.f32 %v2919_v6, %v1512_v54  ;;  %v3417_v34 = vld [vmem:[#allocation8 + $0xb0] sm:$0xff]  }
 0x19e   :  { %v2921_v52 = vpop.f32.mrf.mxu1  ;;  %v3421_v39 = vld [vmem:[#allocation8 + $0x90] sm:$0xff]  }
 0x19f   :  { %3027 = vmatpush3.bf16.msra.mxu1 %v3379_v51  ;;  %v1515_v55 = vadd.f32 %v2900_v50, %v1474_v53  ;;  %v2922_v56 = vadd.f32 %v2921_v52, %v2920_v41  ;;  %v3408_v51 = vld [vmem:[#allocation8 + $0x58] sm:$0xff]   ;;  %v3422_v41 = vld [vmem:[#allocation8 + $0x88] sm:$0xff]  }
 0x1a0   :  { %3028 = vmatprep.subr.bf16.mxu1 %v3543_v46  ;;  %v1705_v52 = vld [vmem:[%s3712_s4] sm:$0x7] }
 0x1a1   :  { %v1556_v60 = vadd.f32 %v2922_v56, %v1515_v55  ;;  %v1714_v54 = vrot.slane %v1705_v52, %v323_v42  ;;  %v1710_v6 = vrot.slane %v1705_v52, %v319_v44 }
 0x1a3   :  { %3029 = vmatpush3.bf16.msra.mxu1 %v3383_v27  ;;  %v3410_v27 = vld [vmem:[#allocation8 + $0x50] sm:$0xff]  }
 0x1a4   :  { %3034 = vmatprep.subr.bf16.mxu1 %v3543_v46 }
 0x1b6   :  { %v1593_v57 = vpop.f32.mrf.mxu0 }
 0x1b7   :  { %v1594_v47 = vadd.f32 %v1593_v57, %v1553_v58 }
 0x1b8   :  { %v3012_v59 = vpop.f32.mrf.mxu0 }
 0x1b9   :  { %v1602_v63 = vmax.f32 %v1594_v47, 0.0 }
 0x1ba   :  { %v1596_v61 = vpop.f32.mrf.mxu0 }
 0x1bb   :  { %v1597_v43 = vadd.f32 %v1596_v61, %v1556_v60 }
 0x1bc   :  { %v3013_v62 = vpop.f32.mrf.mxu0 }
 0x1bd   :  { %v1605_v0 = vmax.f32 %v1597_v43, 0.0 }
 0x1bf   :  { %v1608_v2 = vpack.c.bf16 %v1605_v0, %v1602_v63 }
 0x1c1   :  { %2182 = vmatmul.mubr.bf16.vlgmr.msra.gmra.mxu0 %v1608_v2  ;;  %3031 = vmatmul.mubr.bf16.vlgmr.msra.gmra.mxu1 %v1608_v2 }
 0x1c2   :  { %2933 = vmatpush3.bf16.msra.mxu0 %v3385_v1  ;;  %2224 = vmatprep.mubr.bf16.mxu0 %v3662_v18  ;;  %v3400_v18 = vld [vmem:[#allocation8 + $0x78] sm:$0xff]  }
 0x1c3   :  { %2934 = vmatprep.subr.bf16.mxu0 %v3386_v4  ;;  %3050 = vmatprep.mubr.msk.bf16.mxu1 %vm3544_vm0, %v3543_v46 }
 0x1c4   :  { %3035 = vmatpush3.bf16.msra.mxu1 %v3416_v32 }
 0x1c5   :  { %3036 = vmatprep.subr.bf16.mxu1 %v3543_v46 }
 0x1c6   :  { %2935 = vmatpush3.bf16.msra.mxu0 %v3387_v5 }
 0x1c7   :  { %2936 = vmatprep.subr.bf16.mxu0 %v3388_v7 }
 0x1c8   :  { %3037 = vmatpush3.bf16.msra.mxu1 %v3417_v34 }
 0x1c9   :  { %3038 = vmatprep.subr.bf16.mxu1 %v3543_v46 }
 0x1ca   :  { %2937 = vmatpush3.bf16.msra.mxu0 %v3389_v8 }
 0x1cb   :  { %2938 = vmatprep.subr.bf16.mxu0 %v3390_v9 }
 0x1cc   :  { %3039 = vmatpush3.bf16.msra.mxu1 %v3418_v35 }
 0x1cd   :  { %3040 = vmatprep.subr.bf16.mxu1 %v3543_v46 }
 0x1ce   :  { %2939 = vmatpush3.bf16.msra.mxu0 %v3391_v10 }
 0x1cf   :  { %2940 = vmatprep.subr.bf16.mxu0 %v3392_v11  ;;  %v1718_v11 = vrot.slane %v1705_v52, %v327_v33 }
 0x1d0   :  { %3041 = vmatpush3.bf16.msra.mxu1 %v3419_v36 }
 0x1d1   :  { %3042 = vmatprep.subr.bf16.mxu1 %v3543_v46 }
 0x1d2   :  { %2941 = vmatpush3.bf16.msra.mxu0 %v3393_v12 }
 0x1d3   :  { %2942 = vmatprep.subr.bf16.mxu0 %v3394_v14 }
 0x1d4   :  { %3043 = vmatpush3.bf16.msra.mxu1 %v3420_v37 }
 0x1d5   :  { %3044 = vmatprep.subr.bf16.mxu1 %v3543_v46 }
 0x1d6   :  { %2943 = vmatpush3.bf16.msra.mxu0 %v3395_v15 }
 0x1d7   :  { %2944 = vmatprep.subr.bf16.mxu0 %v3396_v16 }
 0x1d8   :  { %3045 = vmatpush3.bf16.msra.mxu1 %v3421_v39 }
 0x1d9   :  { %3046 = vmatprep.subr.bf16.mxu1 %v3543_v46 }
 0x1da   :  { %2945 = vmatpush3.bf16.msra.mxu0 %v3397_v40 }
 0x1db   :  { %2946 = vmatprep.subr.bf16.mxu0 %v3398_v17 }
 0x1dc   :  { %3047 = vmatpush3.bf16.msra.mxu1 %v3422_v41 }
 0x1dd   :  { %3048 = vmatprep.subr.bf16.mxu1 %v3543_v46 }
 0x1de   :  { %2947 = vmatpush3.bf16.msra.mxu0 %v3399_v13 }
 0x1df   :  { %2963 = vmatprep.subr.bf16.mxu0 %v3400_v18 }
 0x1e0   :  { %3049 = vmatpush3.bf16.msra.mxu1 %v3423_v45 }
 0x1e1   :  { %2225 = vmatmul.mubr.bf16.vlgmr.msra.gmra.mxu0 %v3664_v20  ;;  %v3412_v20 = vld [vmem:[#allocation8 + $0x48] sm:$0xff]  }
 0x1e2   :  { %2964 = vmatpush3.bf16.msra.mxu0 %v3401_v19 }
 0x1e3   :  { %2965 = vmatprep.subr.bf16.mxu0 %v3402_v21 }
 0x1e6   :  { %2966 = vmatpush3.bf16.msra.mxu0 %v3403_v22 }
 0x1e7   :  { %2967 = vmatprep.subr.bf16.mxu0 %v3404_v23 }
 0x1ea   :  { %2968 = vmatpush3.bf16.msra.mxu0 %v3405_v24 }
 0x1eb   :  { %2969 = vmatprep.subr.bf16.mxu0 %v3406_v25 }
 0x1ee   :  { %2970 = vmatpush3.bf16.msra.mxu0 %v3407_v26 }
 0x1ef   :  { %2971 = vmatprep.subr.bf16.mxu0 %v3408_v51 }
 0x1f2   :  { %2972 = vmatpush3.bf16.msra.mxu0 %v3409_v3 }
 0x1f3   :  { %2973 = vmatprep.subr.bf16.mxu0 %v3410_v27 }
 0x1f6   :  { %2974 = vmatpush3.bf16.msra.mxu0 %v3411_v28 }
 0x1f7   :  { %2975 = vmatprep.subr.bf16.mxu0 %v3412_v20 }
 0x1fa   :  { %2976 = vmatpush3.bf16.msra.mxu0 %v3413_v29 }
 0x1fb   :  { %2977 = vmatprep.subr.bf16.mxu0 %v3414_v30 }
 0x1fe   :  { %2978 = vmatpush3.bf16.msra.mxu0 %v3415_v31 }
 0x246   :  { %v2140_v48 = vpop.f32.mrf.mxu1 }
 0x247   :  { %v2141_v47 = vadd.f32 %v2140_v48, %v1710_v6 }
 0x248   :  { %v2142_v49 = vpop.f32.mrf.mxu1 }
 0x249   :  { %v2143_v58 = vadd.f32 %v2142_v49, %v1714_v54 }
 0x24a   :  { %v2144_v50 = vpop.f32.mrf.mxu1 }
 0x24b   :  { %v2145_v59 = vadd.f32 %v2144_v50, %v1710_v6 }
 0x24c   :  { %v2146_v53 = vpop.f32.mrf.mxu1 }
 0x24d   :  { %v2147_v43 = vadd.f32 %v2146_v53, %v1714_v54 }
 0x281   :  { %v2183_v55 = vpop.f32.mrf.mxu0  ;;  %v2267_v56 = vpop.f32.mrf.mxu1 }
 0x282   :  { %v2184_v0 = vadd.f32 %v2183_v55, %v2141_v47 }
 0x283   :  { %v2185_v57 = vpop.f32.mrf.mxu0  ;;  %v3032_v46 = vpop.f32.mrf.mxu1 }
 0x284   :  { %v2186_v62 = vadd.f32 %v2185_v57, %v2143_v58  ;;  %v2274_v44 = vmax.f32 %v2184_v0, 0.0 }
 0x285   :  { %v2187_v60 = vpop.f32.mrf.mxu0  ;;  %v2270_v61 = vpop.f32.mrf.mxu1 }
 0x286   :  { %v2188_v63 = vadd.f32 %v2187_v60, %v2145_v59  ;;  %v2275_v5 = vmax.f32 %v2186_v62, 0.0 }
 0x287   :  { %v2189_v1 = vpop.f32.mrf.mxu0  ;;  %v3033_v2 = vpop.f32.mrf.mxu1 }
 0x288   :  { %v2190_v4 = vadd.f32 %v2189_v1, %v2147_v43  ;;  %v2277_v42 = vmax.f32 %v2188_v63, 0.0 }
 0x28a   :  { %v2278_v7 = vmax.f32 %v2190_v4, 0.0  ;;  %v2280_v9 = vpack.c.bf16 %v2277_v42, %v2274_v44 }
 0x28c   :  { %v2281_v8 = vpack.c.bf16 %v2278_v7, %v2275_v5 }
 0x28e   :  { %2514 = vmatprep.mubr.bf16.mxu0 %v2281_v8 }
 0x28f   :  { %2515 = vmatmul.mubr.bf16.vlgmr.msra.gmra.mxu0 %v2280_v9 }
 0x2a1   :  { %v2948_v10 = vpop.f32.mrf.mxu0 }
 0x2a3   :  { %v2949_v12 = vpop.f32.mrf.mxu0 }
 0x2a4   :  { %v2950_v14 = vadd.f32 %v2949_v12, %v2948_v10 }
 0x2a5   :  { %v2951_v15 = vpop.f32.mrf.mxu0 }
 0x2a6   :  { %v2227_v16 = vadd.f32 %v2950_v14, %v1718_v11 }
 0x2a7   :  { %v2952_v40 = vpop.f32.mrf.mxu0 }
 0x2a8   :  { %v2953_v17 = vadd.f32 %v2952_v40, %v2951_v15  ;;  %v2268_v13 = vadd.f32 %v2267_v56, %v2227_v16 }
 0x2aa   :  { %v2230_v18 = vadd.f32 %v2953_v17, %v1718_v11  ;;  %v2276_v21 = vmax.f32 %v2268_v13, 0.0 }
 0x2ac   :  { %v2271_v19 = vadd.f32 %v2270_v61, %v2230_v18 }
 0x2ae   :  { %v2279_v22 = vmax.f32 %v2271_v19, 0.0 }
 0x2b0   :  { %v2282_v23 = vpack.c.bf16 %v2279_v22, %v2276_v21 }
 0x2b2   :  { %3051 = vmatmul.mubr.bf16.vlgmr.msra.gmra.mxu1 %v2282_v23 }
 0x34f   :  { %v2979_v24 = vpop.f32.mrf.mxu0 }
 0x351   :  { %v2980_v25 = vpop.f32.mrf.mxu0 }
 0x352   :  { %v2981_v51 = vadd.f32 %v2980_v25, %v2979_v24 }
 0x353   :  { %v2982_v26 = vpop.f32.mrf.mxu0 }
 0x354   :  { %v2517_v27 = vadd.f32 %v2981_v51, %v2832_v38 }
 0x355   :  { %v2983_v3 = vpop.f32.mrf.mxu0 }
 0x356   :  { %v2984_v33 = vadd.f32 %v2983_v3, %v2982_v26 }
 0x358   :  { %v2520_v30 = vadd.f32 %v2984_v33, %v2832_v38 }
 0x372   :  { %v2557_v28 = vpop.f32.mrf.mxu1 }
 0x373   :  { %v2558_v20 = vadd.f32 %v2557_v28, %v2517_v27 }
 0x374   :  { %v3052_v29 = vpop.f32.mrf.mxu1 }
 0x375   :  { %2564 = vst [vmem:[#allocation10] sm:$0xff] %v2558_v20 }
 0x376   :  { %v2560_v31 = vpop.f32.mrf.mxu1 }
 0x377   :  { %v2561_v32 = vadd.f32 %v2560_v31, %v2520_v30 }
 0x378   :  { %v3053_v34 = vpop.f32.mrf.mxu1 }
 0x379   :  { %2565 = vst [vmem:[#allocation10 + $0x8] sm:$0xff] %v2561_v32 }
 0x37a   :  { %3515 = shalt.err (!%p3512_p10)
}
 0x37b   :  { %s3546_s6 = smov 128   ;;  %s3547_s30 = smov 8  }
 0x37c   :  { %2577 = dma.vmem_to_hbm [thread:$0]  %s2572_s28, 256, %s3715_s7, [#allocation4], %s3546_s6, %s3546_s6, %s3547_s30  }
 0x37d   :  { %3530 = dma.done.wait [#allocation4], 256  }
 0x37e   :  { %3531 = vsyncadd [#allocation4], 4294967040 }
 0x37f   :  { %2581 = vsyncpa [#allocation3], 1 }
 0x380   :  { %2582 = vsyncpa [#allocation6], 1 }
 0x381   :  { %2583 = vsyncpa [#allocation9], 1 }
 0x382   :  { %2584 = vsyncpa [#allocation4], 1 }

</bundles_post_ra>
